<compile_context>
chip_gen: v5e
topology: v5e:2x2
jax: 0.10.0
libtpu: 0.0.40
codegen_flags: <defaults>
</compile_context>

<pallas_src>
import numpy as np
import jax
import jax.numpy as jnp
from jax import lax
from jax.experimental import pallas as pl
from jax.experimental.pallas import tpu as pltpu

HIDDEN = 10  # fixed by the PyTorch module (hidden_size=10, input_size=1, fc: 10 -> 1)


def _cdiv(a, b):
    return -(-a // b)


def _round_lanes(v):
    return max(128, (v // 128) * 128)


def _pick_tb(B, Tc, tb_req):
    tb = _round_lanes(min(max(tb_req, 128), 1024))        # 512-1024 sweet spot before vreg spills
    tb = min(tb, _round_lanes((24 << 20) // (8 * Tc)))    # double-buffered f32 (Tc, tb) <= ~24 MiB
    b_pad = _cdiv(B, 128) * 128
    tb = min(tb, b_pad)                                   # don't over-pad tiny batches
    if b_pad >= 256:                                      # >= 2 batch tiles: both v7x TCs busy
        tb = min(tb, _round_lanes(_cdiv(b_pad, 2)))
    return max(tb, 128)


def _make_kernel(T, Tc, hidden, full_unroll, need_mask, unroll_len):
    def kernel(x_ref, wih_ref, whh_ref, bias_ref, wfc_ref, bfc_ref, out_ref, h_ref):
        # x_ref:    (Tc, tb)  time-major input chunk, batch on the lane axis
        # wih_ref:  (H, 1)    W_ih (input_size == 1)
        # whh_ref:  (H, H)    W_hh
        # bias_ref: (H, 1)    b_ih + b_hh
        # wfc_ref:  (H, 1)    fc weight as a column
        # bfc_ref:  (1, 1)    fc bias
        # out_ref:  (1, tb)   lane-dense prediction row for this batch tile
        # h_ref:    (H, tb)   VMEM scratch carrying the hidden state across T-chunks
        tc = pl.program_id(1)

        @pl.when(tc == 0)
        def _():
            h_ref[...] = jnp.zeros_like(h_ref)

        # Hoist all loop-invariant values, including the 10 W_hh column selects (JAX does not
        # CSE broadcast_in_dim; left in the step they are re-emitted T x 10 times on the XLU).
        wih = wih_ref[...]          # (H, 1)
        bias = bias_ref[...]        # (H, 1)
        whh = whh_ref[...]          # (H, H)
        whh_cols = [whh[:, i:i + 1] for i in range(hidden)]

        def step_math(xt, h, valid=None):
            # 11 independent products folded into 4 accumulation chains (shorter per-step
            # critical path on the serial t-chain), one tree-add, then tanh on the EUP.
            terms = [wih * xt + bias]
            terms += [whh_cols[i] * h[i:i + 1, :] for i in range(hidden)]
            chains = list(terms[:4])
            for j, term in enumerate(terms[4:]):
                chains[j % 4] = chains[j % 4] + term
            h_new = jnp.tanh((chains[0] + chains[1]) + (chains[2] + chains[3]))
            if valid is not None:
                h_new = jnp.where(valid, h_new, h)        # only for a ragged final T-chunk
            return h_new

        h0 = h_ref[...]
        if full_unroll:
            hoist_x = Tc * x_ref.shape[1] <= 16 * 1024    # whole chunk fits a few vregs
            x_all = x_ref[...] if hoist_x else None
            h = h0
            for t in range(Tc):                           # static indices on the unrolled path
                xt = x_all[t:t + 1, :] if hoist_x else x_ref[t:t + 1, :]
                h = step_math(xt, h)
            hT = h
        else:
            def body(t, h):
                xt = x_ref[pl.ds(t, 1), :]
                valid = (tc * Tc + t) < T if need_mask else None
                return step_math(xt, h, valid)
            hT = lax.fori_loop(0, Tc, body, h0, unroll=unroll_len)

        h_ref[...] = hT

        @pl.when(tc == pl.num_programs(1) - 1)
        def _():
            # fc(10 -> 1) fused as a sublane reduce; lane-dense (1, tb) store.
            out_ref[...] = (jnp.sum(hT * wfc_ref[...], axis=0, keepdims=True)
                            + bfc_ref[...])

    return kernel


def rnn_classifier_forward(x, params, tb=512, t_chunk=512):
    """x: (B, T, 1) float32.  Returns (B, 1) float32, matching the PyTorch forward."""
    W_ih, W_hh, b_ih, b_hh, W_fc, b_fc = params
    B, T, _ = x.shape

    Tc = T if T <= t_chunk else t_chunk
    n_tc = _cdiv(T, Tc)
    T_pad = n_tc * Tc
    need_mask = T_pad != T

    tb = _pick_tb(B, Tc, tb)
    n_b = _cdiv(B, tb)
    Bp = n_b * tb

    # Time-major with batch on the lane axis (XLA fuses slice + transpose + pad into one copy).
    # TODO(synk): reading x in native (B, T) order plus a per-tile in-kernel transpose would
    # remove this extra HBM pass; kept wrapper-side for lowering robustness.
    x_tb = jnp.transpose(x[..., 0].astype(jnp.float32), (1, 0))          # (T, B)
    if T_pad != T or Bp != B:
        x_tb = jnp.pad(x_tb, ((0, T_pad - T), (0, Bp - B)))              # (T_pad, Bp)

    wih = W_ih.reshape(HIDDEN, 1).astype(jnp.float32)                    # (H, 1)
    whh = W_hh.astype(jnp.float32)                                       # (H, H)
    bias = (b_ih + b_hh).reshape(HIDDEN, 1).astype(jnp.float32)          # (H, 1)
    wfc = W_fc.reshape(HIDDEN, 1).astype(jnp.float32)                    # (H, 1) == W_fc^T
    bfc = b_fc.reshape(1, 1).astype(jnp.float32)                         # (1, 1)

    kernel = _make_kernel(T=T, Tc=Tc, hidden=HIDDEN,
                          full_unroll=Tc <= 64, need_mask=need_mask, unroll_len=16)

    out = pl.pallas_call(
        kernel,
        out_shape=jax.ShapeDtypeStruct((1, Bp), jnp.float32),
        grid_spec=pltpu.PrefetchScalarGridSpec(
            num_scalar_prefetch=0,
            grid=(n_b, n_tc),                                            # batch tiles x T-chunks
            in_specs=[
                pl.BlockSpec((Tc, tb), lambda i, t: (t, i)),             # x: pipelined chunks
                pl.BlockSpec((HIDDEN, 1), lambda i, t: (0, 0)),          # W_ih (resident)
                pl.BlockSpec((HIDDEN, HIDDEN), lambda i, t: (0, 0)),     # W_hh (resident)
                pl.BlockSpec((HIDDEN, 1), lambda i, t: (0, 0)),          # b_ih + b_hh (resident)
                pl.BlockSpec((HIDDEN, 1), lambda i, t: (0, 0)),          # W_fc^T (resident)
                pl.BlockSpec((1, 1), lambda i, t: (0, 0)),               # b_fc (resident)
            ],
            out_specs=pl.BlockSpec((1, tb), lambda i, t: (0, i)),        # lane-dense output row
            scratch_shapes=[pltpu.VMEM((HIDDEN, tb), jnp.float32)],      # h carried across chunks
        ),
        compiler_params=pltpu.CompilerParams(
            dimension_semantics=("parallel", "arbitrary"),               # batch megacore-sharded
        ),
    )(x_tb, wih, whh, bias, wfc, bfc)

    return jnp.transpose(out[:, :B], (1, 0))                             # (B, 1)


def reference_forward(x, params):
    """Pure-JAX reference mirroring nn.RNN(tanh) + Linear on the last timestep."""
    W_ih, W_hh, b_ih, b_hh, W_fc, b_fc = params
    B, T, _ = x.shape
    hp = jax.lax.Precision.HIGHEST
    h = jnp.zeros((B, HIDDEN), jnp.float32)
    for t in range(T):
        h = jnp.tanh(jnp.dot(x[:, t, :], W_ih.T, precision=hp) + b_ih
                     + jnp.dot(h, W_hh.T, precision=hp) + b_hh)
    return jnp.dot(h, W_fc.T, precision=hp) + b_fc


def init_params(key):
    """Deterministic synthetic params with the same shapes / init range as PyTorch."""
    k = 1.0 / np.sqrt(HIDDEN)
    ks = jax.random.split(key, 6)
    W_ih = jax.random.uniform(ks[0], (HIDDEN, 1), jnp.float32, -k, k)       # rnn.weight_ih_l0
    W_hh = jax.random.uniform(ks[1], (HIDDEN, HIDDEN), jnp.float32, -k, k)  # rnn.weight_hh_l0
    b_ih = jax.random.uniform(ks[2], (HIDDEN,), jnp.float32, -k, k)         # rnn.bias_ih_l0
    b_hh = jax.random.uniform(ks[3], (HIDDEN,), jnp.float32, -k, k)         # rnn.bias_hh_l0
    W_fc = jax.random.uniform(ks[4], (1, HIDDEN), jnp.float32, -k, k)       # fc.weight
    b_fc = jax.random.uniform(ks[5], (1,), jnp.float32, -k, k)              # fc.bias
    return (W_ih, W_hh, b_ih, b_hh, W_fc, b_fc)


if __name__ == "__main__":
    key = jax.random.PRNGKey(0)
    pkey, xkey1, xkey2 = jax.random.split(key, 3)
    params = init_params(pkey)

    # Small demo shape (fully-unrolled single T-chunk, single batch tile).
    B, T = 8, 8
    x = jax.random.normal(xkey1, (B, T, 1), dtype=jnp.float32)
    out = jax.block_until_ready(rnn_classifier_forward(x, params))
    ref = reference_forward(x, params)
    assert out.shape == (B, 1)
    np.testing.assert_allclose(np.asarray(out), np.asarray(ref), atol=1e-5, rtol=1e-5)

    # Slightly larger shape (exercises multiple batch tiles + the fori_loop path).
    B2, T2 = 192, 80
    x2 = jax.random.normal(xkey2, (B2, T2, 1), dtype=jnp.float32)
    out2 = jax.block_until_ready(rnn_classifier_forward(x2, params))
    ref2 = reference_forward(x2, params)
    assert out2.shape == (B2, 1)
    np.testing.assert_allclose(np.asarray(out2), np.asarray(ref2), atol=1e-4, rtol=1e-4)

    print("KERNEL_OK")
</pallas_src>

<mosaic_0001>
module attributes {stable_mosaic.version = 11 : i64} {
  func.func @kernel(%arg0: i32, %arg1: i32, %arg2: memref<8x128xf32, #tpu.memory_space<vmem>>, %arg3: memref<10x1xf32, #tpu.memory_space<vmem>>, %arg4: memref<10x10xf32, #tpu.memory_space<vmem>>, %arg5: memref<10x1xf32, #tpu.memory_space<vmem>>, %arg6: memref<10x1xf32, #tpu.memory_space<vmem>>, %arg7: memref<1x1xf32, #tpu.memory_space<vmem>>, %arg8: memref<1x128xf32, #tpu.memory_space<vmem>>, %arg9: memref<10x128xf32, #tpu.memory_space<vmem>>) attributes {dimension_semantics = [#tpu.dimension_semantics<parallel>, #tpu.dimension_semantics<arbitrary>], iteration_bounds = array<i64: 1, 1>, scalar_prefetch = 0 : i64, scratch_operands = 1 : i64, tpu.core_type = #tpu.core_type<tc>, window_params = [{transform_indices = @transform_0, window_bounds = array<i64: 8, 128>}, {pipeline_mode = #tpu.pipeline_mode<synchronous>, transform_indices = @transform_1, window_bounds = array<i64: 10, 1>}, {pipeline_mode = #tpu.pipeline_mode<synchronous>, transform_indices = @transform_2, window_bounds = array<i64: 10, 10>}, {pipeline_mode = #tpu.pipeline_mode<synchronous>, transform_indices = @transform_3, window_bounds = array<i64: 10, 1>}, {pipeline_mode = #tpu.pipeline_mode<synchronous>, transform_indices = @transform_4, window_bounds = array<i64: 10, 1>}, {pipeline_mode = #tpu.pipeline_mode<synchronous>, transform_indices = @transform_5, window_bounds = array<i64: 1, 1>}, {transform_indices = @transform_6, window_bounds = array<i64: 1, 128>}]} {
    %c0_i32 = arith.constant 0 : i32
    %0 = arith.cmpi eq, %arg1, %c0_i32 : i32
    %1 = arith.extui %0 : i1 to i32
    %c0_i32_0 = arith.constant 0 : i32
    %2 = arith.cmpi ne, %1, %c0_i32_0 : i32
    scf.if %2 {
      %cst = arith.constant 0.000000e+00 : f32
      %478 = vector.broadcast %cst : f32 to vector<10x128xf32>
      %c0_14 = arith.constant 0 : index
      %c0_15 = arith.constant 0 : index
      %479 = vector.load %arg9[%c0_14, %c0_15] : memref<10x128xf32, #tpu.memory_space<vmem>>, vector<10x128xf32>
      tpu.vector_store %arg9[%c0_14, %c0_15], %478 {strides = array<i32>} : memref<10x128xf32, #tpu.memory_space<vmem>>, vector<10x128xf32>,
    } else {
    }
    %c0 = arith.constant 0 : index
    %c0_1 = arith.constant 0 : index
    %3 = vector.load %arg3[%c0, %c0_1] : memref<10x1xf32, #tpu.memory_space<vmem>>, vector<10x1xf32>
    %c0_2 = arith.constant 0 : index
    %c0_3 = arith.constant 0 : index
    %4 = vector.load %arg5[%c0_2, %c0_3] : memref<10x1xf32, #tpu.memory_space<vmem>>, vector<10x1xf32>
    %c0_4 = arith.constant 0 : index
    %c0_5 = arith.constant 0 : index
    %5 = vector.load %arg4[%c0_4, %c0_5] : memref<10x10xf32, #tpu.memory_space<vmem>>, vector<10x10xf32>
    %6 = vector.extract_strided_slice %5 {offsets = [0, 0], sizes = [10, 1], strides = [1, 1]} : vector<10x10xf32> to vector<10x1xf32>
    %7 = vector.extract_strided_slice %5 {offsets = [0, 1], sizes = [10, 1], strides = [1, 1]} : vector<10x10xf32> to vector<10x1xf32>
    %8 = vector.extract_strided_slice %5 {offsets = [0, 2], sizes = [10, 1], strides = [1, 1]} : vector<10x10xf32> to vector<10x1xf32>
    %9 = vector.extract_strided_slice %5 {offsets = [0, 3], sizes = [10, 1], strides = [1, 1]} : vector<10x10xf32> to vector<10x1xf32>
    %10 = vector.extract_strided_slice %5 {offsets = [0, 4], sizes = [10, 1], strides = [1, 1]} : vector<10x10xf32> to vector<10x1xf32>
    %11 = vector.extract_strided_slice %5 {offsets = [0, 5], sizes = [10, 1], strides = [1, 1]} : vector<10x10xf32> to vector<10x1xf32>
    %12 = vector.extract_strided_slice %5 {offsets = [0, 6], sizes = [10, 1], strides = [1, 1]} : vector<10x10xf32> to vector<10x1xf32>
    %13 = vector.extract_strided_slice %5 {offsets = [0, 7], sizes = [10, 1], strides = [1, 1]} : vector<10x10xf32> to vector<10x1xf32>
    %14 = vector.extract_strided_slice %5 {offsets = [0, 8], sizes = [10, 1], strides = [1, 1]} : vector<10x10xf32> to vector<10x1xf32>
    %15 = vector.extract_strided_slice %5 {offsets = [0, 9], sizes = [10, 1], strides = [1, 1]} : vector<10x10xf32> to vector<10x1xf32>
    %c0_6 = arith.constant 0 : index
    %c0_7 = arith.constant 0 : index
    %16 = vector.load %arg9[%c0_6, %c0_7] : memref<10x128xf32, #tpu.memory_space<vmem>>, vector<10x128xf32>
    %c0_8 = arith.constant 0 : index
    %c0_9 = arith.constant 0 : index
    %17 = vector.load %arg2[%c0_8, %c0_9] : memref<8x128xf32, #tpu.memory_space<vmem>>, vector<8x128xf32>
    %18 = vector.extract_strided_slice %17 {offsets = [0, 0], sizes = [1, 128], strides = [1, 1]} : vector<8x128xf32> to vector<1x128xf32>
    %19 = vector.broadcast %3 : vector<10x1xf32> to vector<10x128xf32>
    %20 = vector.broadcast %18 : vector<1x128xf32> to vector<10x128xf32>
    %21 = arith.mulf %19, %20 : vector<10x128xf32>
    %22 = vector.broadcast %4 : vector<10x1xf32> to vector<10x128xf32>
    %23 = arith.addf %21, %22 : vector<10x128xf32>
    %24 = vector.extract_strided_slice %16 {offsets = [0, 0], sizes = [1, 128], strides = [1, 1]} : vector<10x128xf32> to vector<1x128xf32>
    %25 = vector.broadcast %6 : vector<10x1xf32> to vector<10x128xf32>
    %26 = vector.broadcast %24 : vector<1x128xf32> to vector<10x128xf32>
    %27 = arith.mulf %25, %26 : vector<10x128xf32>
    %28 = vector.extract_strided_slice %16 {offsets = [1, 0], sizes = [1, 128], strides = [1, 1]} : vector<10x128xf32> to vector<1x128xf32>
    %29 = vector.broadcast %7 : vector<10x1xf32> to vector<10x128xf32>
    %30 = vector.broadcast %28 : vector<1x128xf32> to vector<10x128xf32>
    %31 = arith.mulf %29, %30 : vector<10x128xf32>
    %32 = vector.extract_strided_slice %16 {offsets = [2, 0], sizes = [1, 128], strides = [1, 1]} : vector<10x128xf32> to vector<1x128xf32>
    %33 = vector.broadcast %8 : vector<10x1xf32> to vector<10x128xf32>
    %34 = vector.broadcast %32 : vector<1x128xf32> to vector<10x128xf32>
    %35 = arith.mulf %33, %34 : vector<10x128xf32>
    %36 = vector.extract_strided_slice %16 {offsets = [3, 0], sizes = [1, 128], strides = [1, 1]} : vector<10x128xf32> to vector<1x128xf32>
    %37 = vector.broadcast %9 : vector<10x1xf32> to vector<10x128xf32>
    %38 = vector.broadcast %36 : vector<1x128xf32> to vector<10x128xf32>
    %39 = arith.mulf %37, %38 : vector<10x128xf32>
    %40 = vector.extract_strided_slice %16 {offsets = [4, 0], sizes = [1, 128], strides = [1, 1]} : vector<10x128xf32> to vector<1x128xf32>
    %41 = vector.broadcast %10 : vector<10x1xf32> to vector<10x128xf32>
    %42 = vector.broadcast %40 : vector<1x128xf32> to vector<10x128xf32>
    %43 = arith.mulf %41, %42 : vector<10x128xf32>
    %44 = vector.extract_strided_slice %16 {offsets = [5, 0], sizes = [1, 128], strides = [1, 1]} : vector<10x128xf32> to vector<1x128xf32>
    %45 = vector.broadcast %11 : vector<10x1xf32> to vector<10x128xf32>
    %46 = vector.broadcast %44 : vector<1x128xf32> to vector<10x128xf32>
    %47 = arith.mulf %45, %46 : vector<10x128xf32>
    %48 = vector.extract_strided_slice %16 {offsets = [6, 0], sizes = [1, 128], strides = [1, 1]} : vector<10x128xf32> to vector<1x128xf32>
    %49 = vector.broadcast %12 : vector<10x1xf32> to vector<10x128xf32>
    %50 = vector.broadcast %48 : vector<1x128xf32> to vector<10x128xf32>
    %51 = arith.mulf %49, %50 : vector<10x128xf32>
    %52 = vector.extract_strided_slice %16 {offsets = [7, 0], sizes = [1, 128], strides = [1, 1]} : vector<10x128xf32> to vector<1x128xf32>
    %53 = vector.broadcast %13 : vector<10x1xf32> to vector<10x128xf32>
    %54 = vector.broadcast %52 : vector<1x128xf32> to vector<10x128xf32>
    %55 = arith.mulf %53, %54 : vector<10x128xf32>
    %56 = vector.extract_strided_slice %16 {offsets = [8, 0], sizes = [1, 128], strides = [1, 1]} : vector<10x128xf32> to vector<1x128xf32>
    %57 = vector.broadcast %14 : vector<10x1xf32> to vector<10x128xf32>
    %58 = vector.broadcast %56 : vector<1x128xf32> to vector<10x128xf32>
    %59 = arith.mulf %57, %58 : vector<10x128xf32>
    %60 = vector.extract_strided_slice %16 {offsets = [9, 0], sizes = [1, 128], strides = [1, 1]} : vector<10x128xf32> to vector<1x128xf32>
    %61 = vector.broadcast %15 : vector<10x1xf32> to vector<10x128xf32>
    %62 = vector.broadcast %60 : vector<1x128xf32> to vector<10x128xf32>
    %63 = arith.mulf %61, %62 : vector<10x128xf32>
    %64 = arith.addf %23, %39 : vector<10x128xf32>
    %65 = arith.addf %27, %43 : vector<10x128xf32>
    %66 = arith.addf %31, %47 : vector<10x128xf32>
    %67 = arith.addf %35, %51 : vector<10x128xf32>
    %68 = arith.addf %64, %55 : vector<10x128xf32>
    %69 = arith.addf %65, %59 : vector<10x128xf32>
    %70 = arith.addf %66, %63 : vector<10x128xf32>
    %71 = arith.addf %68, %69 : vector<10x128xf32>
    %72 = arith.addf %70, %67 : vector<10x128xf32>
    %73 = arith.addf %71, %72 : vector<10x128xf32>
    %74 = math.tanh %73 : vector<10x128xf32>
    %75 = vector.extract_strided_slice %17 {offsets = [1, 0], sizes = [1, 128], strides = [1, 1]} : vector<8x128xf32> to vector<1x128xf32>
    %76 = vector.broadcast %3 : vector<10x1xf32> to vector<10x128xf32>
    %77 = vector.broadcast %75 : vector<1x128xf32> to vector<10x128xf32>
    %78 = arith.mulf %76, %77 : vector<10x128xf32>
    %79 = vector.broadcast %4 : vector<10x1xf32> to vector<10x128xf32>
    %80 = arith.addf %78, %79 : vector<10x128xf32>
    %81 = vector.extract_strided_slice %74 {offsets = [0, 0], sizes = [1, 128], strides = [1, 1]} : vector<10x128xf32> to vector<1x128xf32>
    %82 = vector.broadcast %6 : vector<10x1xf32> to vector<10x128xf32>
    %83 = vector.broadcast %81 : vector<1x128xf32> to vector<10x128xf32>
    %84 = arith.mulf %82, %83 : vector<10x128xf32>
    %85 = vector.extract_strided_slice %74 {offsets = [1, 0], sizes = [1, 128], strides = [1, 1]} : vector<10x128xf32> to vector<1x128xf32>
    %86 = vector.broadcast %7 : vector<10x1xf32> to vector<10x128xf32>
    %87 = vector.broadcast %85 : vector<1x128xf32> to vector<10x128xf32>
    %88 = arith.mulf %86, %87 : vector<10x128xf32>
    %89 = vector.extract_strided_slice %74 {offsets = [2, 0], sizes = [1, 128], strides = [1, 1]} : vector<10x128xf32> to vector<1x128xf32>
    %90 = vector.broadcast %8 : vector<10x1xf32> to vector<10x128xf32>
    %91 = vector.broadcast %89 : vector<1x128xf32> to vector<10x128xf32>
    %92 = arith.mulf %90, %91 : vector<10x128xf32>
    %93 = vector.extract_strided_slice %74 {offsets = [3, 0], sizes = [1, 128], strides = [1, 1]} : vector<10x128xf32> to vector<1x128xf32>
    %94 = vector.broadcast %9 : vector<10x1xf32> to vector<10x128xf32>
    %95 = vector.broadcast %93 : vector<1x128xf32> to vector<10x128xf32>
    %96 = arith.mulf %94, %95 : vector<10x128xf32>
    %97 = vector.extract_strided_slice %74 {offsets = [4, 0], sizes = [1, 128], strides = [1, 1]} : vector<10x128xf32> to vector<1x128xf32>
    %98 = vector.broadcast %10 : vector<10x1xf32> to vector<10x128xf32>
    %99 = vector.broadcast %97 : vector<1x128xf32> to vector<10x128xf32>
    %100 = arith.mulf %98, %99 : vector<10x128xf32>
    %101 = vector.extract_strided_slice %74 {offsets = [5, 0], sizes = [1, 128], strides = [1, 1]} : vector<10x128xf32> to vector<1x128xf32>
    %102 = vector.broadcast %11 : vector<10x1xf32> to vector<10x128xf32>
    %103 = vector.broadcast %101 : vector<1x128xf32> to vector<10x128xf32>
    %104 = arith.mulf %102, %103 : vector<10x128xf32>
    %105 = vector.extract_strided_slice %74 {offsets = [6, 0], sizes = [1, 128], strides = [1, 1]} : vector<10x128xf32> to vector<1x128xf32>
    %106 = vector.broadcast %12 : vector<10x1xf32> to vector<10x128xf32>
    %107 = vector.broadcast %105 : vector<1x128xf32> to vector<10x128xf32>
    %108 = arith.mulf %106, %107 : vector<10x128xf32>
    %109 = vector.extract_strided_slice %74 {offsets = [7, 0], sizes = [1, 128], strides = [1, 1]} : vector<10x128xf32> to vector<1x128xf32>
    %110 = vector.broadcast %13 : vector<10x1xf32> to vector<10x128xf32>
    %111 = vector.broadcast %109 : vector<1x128xf32> to vector<10x128xf32>
    %112 = arith.mulf %110, %111 : vector<10x128xf32>
    %113 = vector.extract_strided_slice %74 {offsets = [8, 0], sizes = [1, 128], strides = [1, 1]} : vector<10x128xf32> to vector<1x128xf32>
    %114 = vector.broadcast %14 : vector<10x1xf32> to vector<10x128xf32>
    %115 = vector.broadcast %113 : vector<1x128xf32> to vector<10x128xf32>
    %116 = arith.mulf %114, %115 : vector<10x128xf32>
    %117 = vector.extract_strided_slice %74 {offsets = [9, 0], sizes = [1, 128], strides = [1, 1]} : vector<10x128xf32> to vector<1x128xf32>
    %118 = vector.broadcast %15 : vector<10x1xf32> to vector<10x128xf32>
    %119 = vector.broadcast %117 : vector<1x128xf32> to vector<10x128xf32>
    %120 = arith.mulf %118, %119 : vector<10x128xf32>
    %121 = arith.addf %80, %96 : vector<10x128xf32>
    %122 = arith.addf %84, %100 : vector<10x128xf32>
    %123 = arith.addf %88, %104 : vector<10x128xf32>
    %124 = arith.addf %92, %108 : vector<10x128xf32>
    %125 = arith.addf %121, %112 : vector<10x128xf32>
    %126 = arith.addf %122, %116 : vector<10x128xf32>
    %127 = arith.addf %123, %120 : vector<10x128xf32>
    %128 = arith.addf %125, %126 : vector<10x128xf32>
    %129 = arith.addf %127, %124 : vector<10x128xf32>
    %130 = arith.addf %128, %129 : vector<10x128xf32>
    %131 = math.tanh %130 : vector<10x128xf32>
    %132 = vector.extract_strided_slice %17 {offsets = [2, 0], sizes = [1, 128], strides = [1, 1]} : vector<8x128xf32> to vector<1x128xf32>
    %133 = vector.broadcast %3 : vector<10x1xf32> to vector<10x128xf32>
    %134 = vector.broadcast %132 : vector<1x128xf32> to vector<10x128xf32>
    %135 = arith.mulf %133, %134 : vector<10x128xf32>
    %136 = vector.broadcast %4 : vector<10x1xf32> to vector<10x128xf32>
    %137 = arith.addf %135, %136 : vector<10x128xf32>
    %138 = vector.extract_strided_slice %131 {offsets = [0, 0], sizes = [1, 128], strides = [1, 1]} : vector<10x128xf32> to vector<1x128xf32>
    %139 = vector.broadcast %6 : vector<10x1xf32> to vector<10x128xf32>
    %140 = vector.broadcast %138 : vector<1x128xf32> to vector<10x128xf32>
    %141 = arith.mulf %139, %140 : vector<10x128xf32>
    %142 = vector.extract_strided_slice %131 {offsets = [1, 0], sizes = [1, 128], strides = [1, 1]} : vector<10x128xf32> to vector<1x128xf32>
    %143 = vector.broadcast %7 : vector<10x1xf32> to vector<10x128xf32>
    %144 = vector.broadcast %142 : vector<1x128xf32> to vector<10x128xf32>
    %145 = arith.mulf %143, %144 : vector<10x128xf32>
    %146 = vector.extract_strided_slice %131 {offsets = [2, 0], sizes = [1, 128], strides = [1, 1]} : vector<10x128xf32> to vector<1x128xf32>
    %147 = vector.broadcast %8 : vector<10x1xf32> to vector<10x128xf32>
    %148 = vector.broadcast %146 : vector<1x128xf32> to vector<10x128xf32>
    %149 = arith.mulf %147, %148 : vector<10x128xf32>
    %150 = vector.extract_strided_slice %131 {offsets = [3, 0], sizes = [1, 128], strides = [1, 1]} : vector<10x128xf32> to vector<1x128xf32>
    %151 = vector.broadcast %9 : vector<10x1xf32> to vector<10x128xf32>
    %152 = vector.broadcast %150 : vector<1x128xf32> to vector<10x128xf32>
    %153 = arith.mulf %151, %152 : vector<10x128xf32>
    %154 = vector.extract_strided_slice %131 {offsets = [4, 0], sizes = [1, 128], strides = [1, 1]} : vector<10x128xf32> to vector<1x128xf32>
    %155 = vector.broadcast %10 : vector<10x1xf32> to vector<10x128xf32>
    %156 = vector.broadcast %154 : vector<1x128xf32> to vector<10x128xf32>
    %157 = arith.mulf %155, %156 : vector<10x128xf32>
    %158 = vector.extract_strided_slice %131 {offsets = [5, 0], sizes = [1, 128], strides = [1, 1]} : vector<10x128xf32> to vector<1x128xf32>
    %159 = vector.broadcast %11 : vector<10x1xf32> to vector<10x128xf32>
    %160 = vector.broadcast %158 : vector<1x128xf32> to vector<10x128xf32>
    %161 = arith.mulf %159, %160 : vector<10x128xf32>
    %162 = vector.extract_strided_slice %131 {offsets = [6, 0], sizes = [1, 128], strides = [1, 1]} : vector<10x128xf32> to vector<1x128xf32>
    %163 = vector.broadcast %12 : vector<10x1xf32> to vector<10x128xf32>
    %164 = vector.broadcast %162 : vector<1x128xf32> to vector<10x128xf32>
    %165 = arith.mulf %163, %164 : vector<10x128xf32>
    %166 = vector.extract_strided_slice %131 {offsets = [7, 0], sizes = [1, 128], strides = [1, 1]} : vector<10x128xf32> to vector<1x128xf32>
    %167 = vector.broadcast %13 : vector<10x1xf32> to vector<10x128xf32>
    %168 = vector.broadcast %166 : vector<1x128xf32> to vector<10x128xf32>
    %169 = arith.mulf %167, %168 : vector<10x128xf32>
    %170 = vector.extract_strided_slice %131 {offsets = [8, 0], sizes = [1, 128], strides = [1, 1]} : vector<10x128xf32> to vector<1x128xf32>
    %171 = vector.broadcast %14 : vector<10x1xf32> to vector<10x128xf32>
    %172 = vector.broadcast %170 : vector<1x128xf32> to vector<10x128xf32>
    %173 = arith.mulf %171, %172 : vector<10x128xf32>
    %174 = vector.extract_strided_slice %131 {offsets = [9, 0], sizes = [1, 128], strides = [1, 1]} : vector<10x128xf32> to vector<1x128xf32>
    %175 = vector.broadcast %15 : vector<10x1xf32> to vector<10x128xf32>
    %176 = vector.broadcast %174 : vector<1x128xf32> to vector<10x128xf32>
    %177 = arith.mulf %175, %176 : vector<10x128xf32>
    %178 = arith.addf %137, %153 : vector<10x128xf32>
    %179 = arith.addf %141, %157 : vector<10x128xf32>
    %180 = arith.addf %145, %161 : vector<10x128xf32>
    %181 = arith.addf %149, %165 : vector<10x128xf32>
    %182 = arith.addf %178, %169 : vector<10x128xf32>
    %183 = arith.addf %179, %173 : vector<10x128xf32>
    %184 = arith.addf %180, %177 : vector<10x128xf32>
    %185 = arith.addf %182, %183 : vector<10x128xf32>
    %186 = arith.addf %184, %181 : vector<10x128xf32>
    %187 = arith.addf %185, %186 : vector<10x128xf32>
    %188 = math.tanh %187 : vector<10x128xf32>
    %189 = vector.extract_strided_slice %17 {offsets = [3, 0], sizes = [1, 128], strides = [1, 1]} : vector<8x128xf32> to vector<1x128xf32>
    %190 = vector.broadcast %3 : vector<10x1xf32> to vector<10x128xf32>
    %191 = vector.broadcast %189 : vector<1x128xf32> to vector<10x128xf32>
    %192 = arith.mulf %190, %191 : vector<10x128xf32>
    %193 = vector.broadcast %4 : vector<10x1xf32> to vector<10x128xf32>
    %194 = arith.addf %192, %193 : vector<10x128xf32>
    %195 = vector.extract_strided_slice %188 {offsets = [0, 0], sizes = [1, 128], strides = [1, 1]} : vector<10x128xf32> to vector<1x128xf32>
    %196 = vector.broadcast %6 : vector<10x1xf32> to vector<10x128xf32>
    %197 = vector.broadcast %195 : vector<1x128xf32> to vector<10x128xf32>
    %198 = arith.mulf %196, %197 : vector<10x128xf32>
    %199 = vector.extract_strided_slice %188 {offsets = [1, 0], sizes = [1, 128], strides = [1, 1]} : vector<10x128xf32> to vector<1x128xf32>
    %200 = vector.broadcast %7 : vector<10x1xf32> to vector<10x128xf32>
    %201 = vector.broadcast %199 : vector<1x128xf32> to vector<10x128xf32>
    %202 = arith.mulf %200, %201 : vector<10x128xf32>
    %203 = vector.extract_strided_slice %188 {offsets = [2, 0], sizes = [1, 128], strides = [1, 1]} : vector<10x128xf32> to vector<1x128xf32>
    %204 = vector.broadcast %8 : vector<10x1xf32> to vector<10x128xf32>
    %205 = vector.broadcast %203 : vector<1x128xf32> to vector<10x128xf32>
    %206 = arith.mulf %204, %205 : vector<10x128xf32>
    %207 = vector.extract_strided_slice %188 {offsets = [3, 0], sizes = [1, 128], strides = [1, 1]} : vector<10x128xf32> to vector<1x128xf32>
    %208 = vector.broadcast %9 : vector<10x1xf32> to vector<10x128xf32>
    %209 = vector.broadcast %207 : vector<1x128xf32> to vector<10x128xf32>
    %210 = arith.mulf %208, %209 : vector<10x128xf32>
    %211 = vector.extract_strided_slice %188 {offsets = [4, 0], sizes = [1, 128], strides = [1, 1]} : vector<10x128xf32> to vector<1x128xf32>
    %212 = vector.broadcast %10 : vector<10x1xf32> to vector<10x128xf32>
    %213 = vector.broadcast %211 : vector<1x128xf32> to vector<10x128xf32>
    %214 = arith.mulf %212, %213 : vector<10x128xf32>
    %215 = vector.extract_strided_slice %188 {offsets = [5, 0], sizes = [1, 128], strides = [1, 1]} : vector<10x128xf32> to vector<1x128xf32>
    %216 = vector.broadcast %11 : vector<10x1xf32> to vector<10x128xf32>
    %217 = vector.broadcast %215 : vector<1x128xf32> to vector<10x128xf32>
    %218 = arith.mulf %216, %217 : vector<10x128xf32>
    %219 = vector.extract_strided_slice %188 {offsets = [6, 0], sizes = [1, 128], strides = [1, 1]} : vector<10x128xf32> to vector<1x128xf32>
    %220 = vector.broadcast %12 : vector<10x1xf32> to vector<10x128xf32>
    %221 = vector.broadcast %219 : vector<1x128xf32> to vector<10x128xf32>
    %222 = arith.mulf %220, %221 : vector<10x128xf32>
    %223 = vector.extract_strided_slice %188 {offsets = [7, 0], sizes = [1, 128], strides = [1, 1]} : vector<10x128xf32> to vector<1x128xf32>
    %224 = vector.broadcast %13 : vector<10x1xf32> to vector<10x128xf32>
    %225 = vector.broadcast %223 : vector<1x128xf32> to vector<10x128xf32>
    %226 = arith.mulf %224, %225 : vector<10x128xf32>
    %227 = vector.extract_strided_slice %188 {offsets = [8, 0], sizes = [1, 128], strides = [1, 1]} : vector<10x128xf32> to vector<1x128xf32>
    %228 = vector.broadcast %14 : vector<10x1xf32> to vector<10x128xf32>
    %229 = vector.broadcast %227 : vector<1x128xf32> to vector<10x128xf32>
    %230 = arith.mulf %228, %229 : vector<10x128xf32>
    %231 = vector.extract_strided_slice %188 {offsets = [9, 0], sizes = [1, 128], strides = [1, 1]} : vector<10x128xf32> to vector<1x128xf32>
    %232 = vector.broadcast %15 : vector<10x1xf32> to vector<10x128xf32>
    %233 = vector.broadcast %231 : vector<1x128xf32> to vector<10x128xf32>
    %234 = arith.mulf %232, %233 : vector<10x128xf32>
    %235 = arith.addf %194, %210 : vector<10x128xf32>
    %236 = arith.addf %198, %214 : vector<10x128xf32>
    %237 = arith.addf %202, %218 : vector<10x128xf32>
    %238 = arith.addf %206, %222 : vector<10x128xf32>
    %239 = arith.addf %235, %226 : vector<10x128xf32>
    %240 = arith.addf %236, %230 : vector<10x128xf32>
    %241 = arith.addf %237, %234 : vector<10x128xf32>
    %242 = arith.addf %239, %240 : vector<10x128xf32>
    %243 = arith.addf %241, %238 : vector<10x128xf32>
    %244 = arith.addf %242, %243 : vector<10x128xf32>
    %245 = math.tanh %244 : vector<10x128xf32>
    %246 = vector.extract_strided_slice %17 {offsets = [4, 0], sizes = [1, 128], strides = [1, 1]} : vector<8x128xf32> to vector<1x128xf32>
    %247 = vector.broadcast %3 : vector<10x1xf32> to vector<10x128xf32>
    %248 = vector.broadcast %246 : vector<1x128xf32> to vector<10x128xf32>
    %249 = arith.mulf %247, %248 : vector<10x128xf32>
    %250 = vector.broadcast %4 : vector<10x1xf32> to vector<10x128xf32>
    %251 = arith.addf %249, %250 : vector<10x128xf32>
    %252 = vector.extract_strided_slice %245 {offsets = [0, 0], sizes = [1, 128], strides = [1, 1]} : vector<10x128xf32> to vector<1x128xf32>
    %253 = vector.broadcast %6 : vector<10x1xf32> to vector<10x128xf32>
    %254 = vector.broadcast %252 : vector<1x128xf32> to vector<10x128xf32>
    %255 = arith.mulf %253, %254 : vector<10x128xf32>
    %256 = vector.extract_strided_slice %245 {offsets = [1, 0], sizes = [1, 128], strides = [1, 1]} : vector<10x128xf32> to vector<1x128xf32>
    %257 = vector.broadcast %7 : vector<10x1xf32> to vector<10x128xf32>
    %258 = vector.broadcast %256 : vector<1x128xf32> to vector<10x128xf32>
    %259 = arith.mulf %257, %258 : vector<10x128xf32>
    %260 = vector.extract_strided_slice %245 {offsets = [2, 0], sizes = [1, 128], strides = [1, 1]} : vector<10x128xf32> to vector<1x128xf32>
    %261 = vector.broadcast %8 : vector<10x1xf32> to vector<10x128xf32>
    %262 = vector.broadcast %260 : vector<1x128xf32> to vector<10x128xf32>
    %263 = arith.mulf %261, %262 : vector<10x128xf32>
    %264 = vector.extract_strided_slice %245 {offsets = [3, 0], sizes = [1, 128], strides = [1, 1]} : vector<10x128xf32> to vector<1x128xf32>
    %265 = vector.broadcast %9 : vector<10x1xf32> to vector<10x128xf32>
    %266 = vector.broadcast %264 : vector<1x128xf32> to vector<10x128xf32>
    %267 = arith.mulf %265, %266 : vector<10x128xf32>
    %268 = vector.extract_strided_slice %245 {offsets = [4, 0], sizes = [1, 128], strides = [1, 1]} : vector<10x128xf32> to vector<1x128xf32>
    %269 = vector.broadcast %10 : vector<10x1xf32> to vector<10x128xf32>
    %270 = vector.broadcast %268 : vector<1x128xf32> to vector<10x128xf32>
    %271 = arith.mulf %269, %270 : vector<10x128xf32>
    %272 = vector.extract_strided_slice %245 {offsets = [5, 0], sizes = [1, 128], strides = [1, 1]} : vector<10x128xf32> to vector<1x128xf32>
    %273 = vector.broadcast %11 : vector<10x1xf32> to vector<10x128xf32>
    %274 = vector.broadcast %272 : vector<1x128xf32> to vector<10x128xf32>
    %275 = arith.mulf %273, %274 : vector<10x128xf32>
    %276 = vector.extract_strided_slice %245 {offsets = [6, 0], sizes = [1, 128], strides = [1, 1]} : vector<10x128xf32> to vector<1x128xf32>
    %277 = vector.broadcast %12 : vector<10x1xf32> to vector<10x128xf32>
    %278 = vector.broadcast %276 : vector<1x128xf32> to vector<10x128xf32>
    %279 = arith.mulf %277, %278 : vector<10x128xf32>
    %280 = vector.extract_strided_slice %245 {offsets = [7, 0], sizes = [1, 128], strides = [1, 1]} : vector<10x128xf32> to vector<1x128xf32>
    %281 = vector.broadcast %13 : vector<10x1xf32> to vector<10x128xf32>
    %282 = vector.broadcast %280 : vector<1x128xf32> to vector<10x128xf32>
    %283 = arith.mulf %281, %282 : vector<10x128xf32>
    %284 = vector.extract_strided_slice %245 {offsets = [8, 0], sizes = [1, 128], strides = [1, 1]} : vector<10x128xf32> to vector<1x128xf32>
    %285 = vector.broadcast %14 : vector<10x1xf32> to vector<10x128xf32>
    %286 = vector.broadcast %284 : vector<1x128xf32> to vector<10x128xf32>
    %287 = arith.mulf %285, %286 : vector<10x128xf32>
    %288 = vector.extract_strided_slice %245 {offsets = [9, 0], sizes = [1, 128], strides = [1, 1]} : vector<10x128xf32> to vector<1x128xf32>
    %289 = vector.broadcast %15 : vector<10x1xf32> to vector<10x128xf32>
    %290 = vector.broadcast %288 : vector<1x128xf32> to vector<10x128xf32>
    %291 = arith.mulf %289, %290 : vector<10x128xf32>
    %292 = arith.addf %251, %267 : vector<10x128xf32>
    %293 = arith.addf %255, %271 : vector<10x128xf32>
    %294 = arith.addf %259, %275 : vector<10x128xf32>
    %295 = arith.addf %263, %279 : vector<10x128xf32>
    %296 = arith.addf %292, %283 : vector<10x128xf32>
    %297 = arith.addf %293, %287 : vector<10x128xf32>
    %298 = arith.addf %294, %291 : vector<10x128xf32>
    %299 = arith.addf %296, %297 : vector<10x128xf32>
    %300 = arith.addf %298, %295 : vector<10x128xf32>
    %301 = arith.addf %299, %300 : vector<10x128xf32>
    %302 = math.tanh %301 : vector<10x128xf32>
    %303 = vector.extract_strided_slice %17 {offsets = [5, 0], sizes = [1, 128], strides = [1, 1]} : vector<8x128xf32> to vector<1x128xf32>
    %304 = vector.broadcast %3 : vector<10x1xf32> to vector<10x128xf32>
    %305 = vector.broadcast %303 : vector<1x128xf32> to vector<10x128xf32>
    %306 = arith.mulf %304, %305 : vector<10x128xf32>
    %307 = vector.broadcast %4 : vector<10x1xf32> to vector<10x128xf32>
    %308 = arith.addf %306, %307 : vector<10x128xf32>
    %309 = vector.extract_strided_slice %302 {offsets = [0, 0], sizes = [1, 128], strides = [1, 1]} : vector<10x128xf32> to vector<1x128xf32>
    %310 = vector.broadcast %6 : vector<10x1xf32> to vector<10x128xf32>
    %311 = vector.broadcast %309 : vector<1x128xf32> to vector<10x128xf32>
    %312 = arith.mulf %310, %311 : vector<10x128xf32>
    %313 = vector.extract_strided_slice %302 {offsets = [1, 0], sizes = [1, 128], strides = [1, 1]} : vector<10x128xf32> to vector<1x128xf32>
    %314 = vector.broadcast %7 : vector<10x1xf32> to vector<10x128xf32>
    %315 = vector.broadcast %313 : vector<1x128xf32> to vector<10x128xf32>
    %316 = arith.mulf %314, %315 : vector<10x128xf32>
    %317 = vector.extract_strided_slice %302 {offsets = [2, 0], sizes = [1, 128], strides = [1, 1]} : vector<10x128xf32> to vector<1x128xf32>
    %318 = vector.broadcast %8 : vector<10x1xf32> to vector<10x128xf32>
    %319 = vector.broadcast %317 : vector<1x128xf32> to vector<10x128xf32>
    %320 = arith.mulf %318, %319 : vector<10x128xf32>
    %321 = vector.extract_strided_slice %302 {offsets = [3, 0], sizes = [1, 128], strides = [1, 1]} : vector<10x128xf32> to vector<1x128xf32>
    %322 = vector.broadcast %9 : vector<10x1xf32> to vector<10x128xf32>
    %323 = vector.broadcast %321 : vector<1x128xf32> to vector<10x128xf32>
    %324 = arith.mulf %322, %323 : vector<10x128xf32>
    %325 = vector.extract_strided_slice %302 {offsets = [4, 0], sizes = [1, 128], strides = [1, 1]} : vector<10x128xf32> to vector<1x128xf32>
    %326 = vector.broadcast %10 : vector<10x1xf32> to vector<10x128xf32>
    %327 = vector.broadcast %325 : vector<1x128xf32> to vector<10x128xf32>
    %328 = arith.mulf %326, %327 : vector<10x128xf32>
    %329 = vector.extract_strided_slice %302 {offsets = [5, 0], sizes = [1, 128], strides = [1, 1]} : vector<10x128xf32> to vector<1x128xf32>
    %330 = vector.broadcast %11 : vector<10x1xf32> to vector<10x128xf32>
    %331 = vector.broadcast %329 : vector<1x128xf32> to vector<10x128xf32>
    %332 = arith.mulf %330, %331 : vector<10x128xf32>
    %333 = vector.extract_strided_slice %302 {offsets = [6, 0], sizes = [1, 128], strides = [1, 1]} : vector<10x128xf32> to vector<1x128xf32>
    %334 = vector.broadcast %12 : vector<10x1xf32> to vector<10x128xf32>
    %335 = vector.broadcast %333 : vector<1x128xf32> to vector<10x128xf32>
    %336 = arith.mulf %334, %335 : vector<10x128xf32>
    %337 = vector.extract_strided_slice %302 {offsets = [7, 0], sizes = [1, 128], strides = [1, 1]} : vector<10x128xf32> to vector<1x128xf32>
    %338 = vector.broadcast %13 : vector<10x1xf32> to vector<10x128xf32>
    %339 = vector.broadcast %337 : vector<1x128xf32> to vector<10x128xf32>
    %340 = arith.mulf %338, %339 : vector<10x128xf32>
    %341 = vector.extract_strided_slice %302 {offsets = [8, 0], sizes = [1, 128], strides = [1, 1]} : vector<10x128xf32> to vector<1x128xf32>
    %342 = vector.broadcast %14 : vector<10x1xf32> to vector<10x128xf32>
    %343 = vector.broadcast %341 : vector<1x128xf32> to vector<10x128xf32>
    %344 = arith.mulf %342, %343 : vector<10x128xf32>
    %345 = vector.extract_strided_slice %302 {offsets = [9, 0], sizes = [1, 128], strides = [1, 1]} : vector<10x128xf32> to vector<1x128xf32>
    %346 = vector.broadcast %15 : vector<10x1xf32> to vector<10x128xf32>
    %347 = vector.broadcast %345 : vector<1x128xf32> to vector<10x128xf32>
    %348 = arith.mulf %346, %347 : vector<10x128xf32>
    %349 = arith.addf %308, %324 : vector<10x128xf32>
    %350 = arith.addf %312, %328 : vector<10x128xf32>
    %351 = arith.addf %316, %332 : vector<10x128xf32>
    %352 = arith.addf %320, %336 : vector<10x128xf32>
    %353 = arith.addf %349, %340 : vector<10x128xf32>
    %354 = arith.addf %350, %344 : vector<10x128xf32>
    %355 = arith.addf %351, %348 : vector<10x128xf32>
    %356 = arith.addf %353, %354 : vector<10x128xf32>
    %357 = arith.addf %355, %352 : vector<10x128xf32>
    %358 = arith.addf %356, %357 : vector<10x128xf32>
    %359 = math.tanh %358 : vector<10x128xf32>
    %360 = vector.extract_strided_slice %17 {offsets = [6, 0], sizes = [1, 128], strides = [1, 1]} : vector<8x128xf32> to vector<1x128xf32>
    %361 = vector.broadcast %3 : vector<10x1xf32> to vector<10x128xf32>
    %362 = vector.broadcast %360 : vector<1x128xf32> to vector<10x128xf32>
    %363 = arith.mulf %361, %362 : vector<10x128xf32>
    %364 = vector.broadcast %4 : vector<10x1xf32> to vector<10x128xf32>
    %365 = arith.addf %363, %364 : vector<10x128xf32>
    %366 = vector.extract_strided_slice %359 {offsets = [0, 0], sizes = [1, 128], strides = [1, 1]} : vector<10x128xf32> to vector<1x128xf32>
    %367 = vector.broadcast %6 : vector<10x1xf32> to vector<10x128xf32>
    %368 = vector.broadcast %366 : vector<1x128xf32> to vector<10x128xf32>
    %369 = arith.mulf %367, %368 : vector<10x128xf32>
    %370 = vector.extract_strided_slice %359 {offsets = [1, 0], sizes = [1, 128], strides = [1, 1]} : vector<10x128xf32> to vector<1x128xf32>
    %371 = vector.broadcast %7 : vector<10x1xf32> to vector<10x128xf32>
    %372 = vector.broadcast %370 : vector<1x128xf32> to vector<10x128xf32>
    %373 = arith.mulf %371, %372 : vector<10x128xf32>
    %374 = vector.extract_strided_slice %359 {offsets = [2, 0], sizes = [1, 128], strides = [1, 1]} : vector<10x128xf32> to vector<1x128xf32>
    %375 = vector.broadcast %8 : vector<10x1xf32> to vector<10x128xf32>
    %376 = vector.broadcast %374 : vector<1x128xf32> to vector<10x128xf32>
    %377 = arith.mulf %375, %376 : vector<10x128xf32>
    %378 = vector.extract_strided_slice %359 {offsets = [3, 0], sizes = [1, 128], strides = [1, 1]} : vector<10x128xf32> to vector<1x128xf32>
    %379 = vector.broadcast %9 : vector<10x1xf32> to vector<10x128xf32>
    %380 = vector.broadcast %378 : vector<1x128xf32> to vector<10x128xf32>
    %381 = arith.mulf %379, %380 : vector<10x128xf32>
    %382 = vector.extract_strided_slice %359 {offsets = [4, 0], sizes = [1, 128], strides = [1, 1]} : vector<10x128xf32> to vector<1x128xf32>
    %383 = vector.broadcast %10 : vector<10x1xf32> to vector<10x128xf32>
    %384 = vector.broadcast %382 : vector<1x128xf32> to vector<10x128xf32>
    %385 = arith.mulf %383, %384 : vector<10x128xf32>
    %386 = vector.extract_strided_slice %359 {offsets = [5, 0], sizes = [1, 128], strides = [1, 1]} : vector<10x128xf32> to vector<1x128xf32>
    %387 = vector.broadcast %11 : vector<10x1xf32> to vector<10x128xf32>
    %388 = vector.broadcast %386 : vector<1x128xf32> to vector<10x128xf32>
    %389 = arith.mulf %387, %388 : vector<10x128xf32>
    %390 = vector.extract_strided_slice %359 {offsets = [6, 0], sizes = [1, 128], strides = [1, 1]} : vector<10x128xf32> to vector<1x128xf32>
    %391 = vector.broadcast %12 : vector<10x1xf32> to vector<10x128xf32>
    %392 = vector.broadcast %390 : vector<1x128xf32> to vector<10x128xf32>
    %393 = arith.mulf %391, %392 : vector<10x128xf32>
    %394 = vector.extract_strided_slice %359 {offsets = [7, 0], sizes = [1, 128], strides = [1, 1]} : vector<10x128xf32> to vector<1x128xf32>
    %395 = vector.broadcast %13 : vector<10x1xf32> to vector<10x128xf32>
    %396 = vector.broadcast %394 : vector<1x128xf32> to vector<10x128xf32>
    %397 = arith.mulf %395, %396 : vector<10x128xf32>
    %398 = vector.extract_strided_slice %359 {offsets = [8, 0], sizes = [1, 128], strides = [1, 1]} : vector<10x128xf32> to vector<1x128xf32>
    %399 = vector.broadcast %14 : vector<10x1xf32> to vector<10x128xf32>
    %400 = vector.broadcast %398 : vector<1x128xf32> to vector<10x128xf32>
    %401 = arith.mulf %399, %400 : vector<10x128xf32>
    %402 = vector.extract_strided_slice %359 {offsets = [9, 0], sizes = [1, 128], strides = [1, 1]} : vector<10x128xf32> to vector<1x128xf32>
    %403 = vector.broadcast %15 : vector<10x1xf32> to vector<10x128xf32>
    %404 = vector.broadcast %402 : vector<1x128xf32> to vector<10x128xf32>
    %405 = arith.mulf %403, %404 : vector<10x128xf32>
    %406 = arith.addf %365, %381 : vector<10x128xf32>
    %407 = arith.addf %369, %385 : vector<10x128xf32>
    %408 = arith.addf %373, %389 : vector<10x128xf32>
    %409 = arith.addf %377, %393 : vector<10x128xf32>
    %410 = arith.addf %406, %397 : vector<10x128xf32>
    %411 = arith.addf %407, %401 : vector<10x128xf32>
    %412 = arith.addf %408, %405 : vector<10x128xf32>
    %413 = arith.addf %410, %411 : vector<10x128xf32>
    %414 = arith.addf %412, %409 : vector<10x128xf32>
    %415 = arith.addf %413, %414 : vector<10x128xf32>
    %416 = math.tanh %415 : vector<10x128xf32>
    %417 = vector.extract_strided_slice %17 {offsets = [7, 0], sizes = [1, 128], strides = [1, 1]} : vector<8x128xf32> to vector<1x128xf32>
    %418 = vector.broadcast %3 : vector<10x1xf32> to vector<10x128xf32>
    %419 = vector.broadcast %417 : vector<1x128xf32> to vector<10x128xf32>
    %420 = arith.mulf %418, %419 : vector<10x128xf32>
    %421 = vector.broadcast %4 : vector<10x1xf32> to vector<10x128xf32>
    %422 = arith.addf %420, %421 : vector<10x128xf32>
    %423 = vector.extract_strided_slice %416 {offsets = [0, 0], sizes = [1, 128], strides = [1, 1]} : vector<10x128xf32> to vector<1x128xf32>
    %424 = vector.broadcast %6 : vector<10x1xf32> to vector<10x128xf32>
    %425 = vector.broadcast %423 : vector<1x128xf32> to vector<10x128xf32>
    %426 = arith.mulf %424, %425 : vector<10x128xf32>
    %427 = vector.extract_strided_slice %416 {offsets = [1, 0], sizes = [1, 128], strides = [1, 1]} : vector<10x128xf32> to vector<1x128xf32>
    %428 = vector.broadcast %7 : vector<10x1xf32> to vector<10x128xf32>
    %429 = vector.broadcast %427 : vector<1x128xf32> to vector<10x128xf32>
    %430 = arith.mulf %428, %429 : vector<10x128xf32>
    %431 = vector.extract_strided_slice %416 {offsets = [2, 0], sizes = [1, 128], strides = [1, 1]} : vector<10x128xf32> to vector<1x128xf32>
    %432 = vector.broadcast %8 : vector<10x1xf32> to vector<10x128xf32>
    %433 = vector.broadcast %431 : vector<1x128xf32> to vector<10x128xf32>
    %434 = arith.mulf %432, %433 : vector<10x128xf32>
    %435 = vector.extract_strided_slice %416 {offsets = [3, 0], sizes = [1, 128], strides = [1, 1]} : vector<10x128xf32> to vector<1x128xf32>
    %436 = vector.broadcast %9 : vector<10x1xf32> to vector<10x128xf32>
    %437 = vector.broadcast %435 : vector<1x128xf32> to vector<10x128xf32>
    %438 = arith.mulf %436, %437 : vector<10x128xf32>
    %439 = vector.extract_strided_slice %416 {offsets = [4, 0], sizes = [1, 128], strides = [1, 1]} : vector<10x128xf32> to vector<1x128xf32>
    %440 = vector.broadcast %10 : vector<10x1xf32> to vector<10x128xf32>
    %441 = vector.broadcast %439 : vector<1x128xf32> to vector<10x128xf32>
    %442 = arith.mulf %440, %441 : vector<10x128xf32>
    %443 = vector.extract_strided_slice %416 {offsets = [5, 0], sizes = [1, 128], strides = [1, 1]} : vector<10x128xf32> to vector<1x128xf32>
    %444 = vector.broadcast %11 : vector<10x1xf32> to vector<10x128xf32>
    %445 = vector.broadcast %443 : vector<1x128xf32> to vector<10x128xf32>
    %446 = arith.mulf %444, %445 : vector<10x128xf32>
    %447 = vector.extract_strided_slice %416 {offsets = [6, 0], sizes = [1, 128], strides = [1, 1]} : vector<10x128xf32> to vector<1x128xf32>
    %448 = vector.broadcast %12 : vector<10x1xf32> to vector<10x128xf32>
    %449 = vector.broadcast %447 : vector<1x128xf32> to vector<10x128xf32>
    %450 = arith.mulf %448, %449 : vector<10x128xf32>
    %451 = vector.extract_strided_slice %416 {offsets = [7, 0], sizes = [1, 128], strides = [1, 1]} : vector<10x128xf32> to vector<1x128xf32>
    %452 = vector.broadcast %13 : vector<10x1xf32> to vector<10x128xf32>
    %453 = vector.broadcast %451 : vector<1x128xf32> to vector<10x128xf32>
    %454 = arith.mulf %452, %453 : vector<10x128xf32>
    %455 = vector.extract_strided_slice %416 {offsets = [8, 0], sizes = [1, 128], strides = [1, 1]} : vector<10x128xf32> to vector<1x128xf32>
    %456 = vector.broadcast %14 : vector<10x1xf32> to vector<10x128xf32>
    %457 = vector.broadcast %455 : vector<1x128xf32> to vector<10x128xf32>
    %458 = arith.mulf %456, %457 : vector<10x128xf32>
    %459 = vector.extract_strided_slice %416 {offsets = [9, 0], sizes = [1, 128], strides = [1, 1]} : vector<10x128xf32> to vector<1x128xf32>
    %460 = vector.broadcast %15 : vector<10x1xf32> to vector<10x128xf32>
    %461 = vector.broadcast %459 : vector<1x128xf32> to vector<10x128xf32>
    %462 = arith.mulf %460, %461 : vector<10x128xf32>
    %463 = arith.addf %422, %438 : vector<10x128xf32>
    %464 = arith.addf %426, %442 : vector<10x128xf32>
    %465 = arith.addf %430, %446 : vector<10x128xf32>
    %466 = arith.addf %434, %450 : vector<10x128xf32>
    %467 = arith.addf %463, %454 : vector<10x128xf32>
    %468 = arith.addf %464, %458 : vector<10x128xf32>
    %469 = arith.addf %465, %462 : vector<10x128xf32>
    %470 = arith.addf %467, %468 : vector<10x128xf32>
    %471 = arith.addf %469, %466 : vector<10x128xf32>
    %472 = arith.addf %470, %471 : vector<10x128xf32>
    %473 = math.tanh %472 : vector<10x128xf32>
    %c0_10 = arith.constant 0 : index
    %c0_11 = arith.constant 0 : index
    %474 = vector.load %arg9[%c0_10, %c0_11] : memref<10x128xf32, #tpu.memory_space<vmem>>, vector<10x128xf32>
    tpu.vector_store %arg9[%c0_10, %c0_11], %473 {strides = array<i32>} : memref<10x128xf32, #tpu.memory_space<vmem>>, vector<10x128xf32>,
    %c0_i32_12 = arith.constant 0 : i32
    %475 = arith.cmpi eq, %arg1, %c0_i32_12 : i32
    %476 = arith.extui %475 : i1 to i32
    %c0_i32_13 = arith.constant 0 : i32
    %477 = arith.cmpi ne, %476, %c0_i32_13 : i32
    scf.if %477 {
      %c0_14 = arith.constant 0 : index
      %c0_15 = arith.constant 0 : index
      %478 = vector.load %arg6[%c0_14, %c0_15] : memref<10x1xf32, #tpu.memory_space<vmem>>, vector<10x1xf32>
      %479 = vector.broadcast %478 : vector<10x1xf32> to vector<10x128xf32>
      %480 = arith.mulf %473, %479 : vector<10x128xf32>
      %cst = arith.constant dense<0.000000e+00> : vector<128xf32>
      %481 = vector.multi_reduction <add>, %480, %cst [0] : vector<10x128xf32> to vector<128xf32>
      %482 = vector.shape_cast %481 : vector<128xf32> to vector<1x128xf32>
      %c0_16 = arith.constant 0 : index
      %c0_17 = arith.constant 0 : index
      %483 = vector.load %arg7[%c0_16, %c0_17] : memref<1x1xf32, #tpu.memory_space<vmem>>, vector<1x1xf32>
      %484 = vector.broadcast %483 : vector<1x1xf32> to vector<1x128xf32>
      %485 = arith.addf %482, %484 : vector<1x128xf32>
      %c0_18 = arith.constant 0 : index
      %c0_19 = arith.constant 0 : index
      %486 = vector.load %arg8[%c0_18, %c0_19] : memref<1x128xf32, #tpu.memory_space<vmem>>, vector<1x128xf32>
      tpu.vector_store %arg8[%c0_18, %c0_19], %485 {strides = array<i32>} : memref<1x128xf32, #tpu.memory_space<vmem>>, vector<1x128xf32>,
    } else {
    }
    return
  }
  func.func @transform_0(%arg0: i32, %arg1: i32) -> (i32, i32) {
    %c0_i32 = arith.constant 0 : i32
    return %arg1, %arg0 : i32, i32
  }
  func.func @transform_1(%arg0: i32, %arg1: i32) -> (i32, i32) {
    %c0_i32 = arith.constant 0 : i32
    %c0_i32_0 = arith.constant 0 : i32
    %c0_i32_1 = arith.constant 0 : i32
    return %c0_i32, %c0_i32_0 : i32, i32
  }
  func.func @transform_2(%arg0: i32, %arg1: i32) -> (i32, i32) {
    %c0_i32 = arith.constant 0 : i32
    %c0_i32_0 = arith.constant 0 : i32
    %c0_i32_1 = arith.constant 0 : i32
    return %c0_i32, %c0_i32_0 : i32, i32
  }
  func.func @transform_3(%arg0: i32, %arg1: i32) -> (i32, i32) {
    %c0_i32 = arith.constant 0 : i32
    %c0_i32_0 = arith.constant 0 : i32
    %c0_i32_1 = arith.constant 0 : i32
    return %c0_i32, %c0_i32_0 : i32, i32
  }
  func.func @transform_4(%arg0: i32, %arg1: i32) -> (i32, i32) {
    %c0_i32 = arith.constant 0 : i32
    %c0_i32_0 = arith.constant 0 : i32
    %c0_i32_1 = arith.constant 0 : i32
    return %c0_i32, %c0_i32_0 : i32, i32
  }
  func.func @transform_5(%arg0: i32, %arg1: i32) -> (i32, i32) {
    %c0_i32 = arith.constant 0 : i32
    %c0_i32_0 = arith.constant 0 : i32
    %c0_i32_1 = arith.constant 0 : i32
    return %c0_i32, %c0_i32_0 : i32, i32
  }
  func.func @transform_6(%arg0: i32, %arg1: i32) -> (i32, i32) {
    %c0_i32 = arith.constant 0 : i32
    %c0_i32_0 = arith.constant 0 : i32
    return %c0_i32, %arg0 : i32, i32
  }
}

</mosaic_0001>

<bundles_post_ra>
// kernel: tpu_custom_call.1
= control target key start
LH: loop header
LB: loop body
LE: loop exit
PB: predicated region body
PF: predicated region fallthrough
CT: control target
= control target key end

     0   :  { %s1125_s0 = inlined_call_operand.vmem [shape: f32[8,128], index: 0, kind: input, shape index: {}]   ;;  %s1126_s1 = inlined_call_operand.vmem [shape: f32[10,1], index: 1, kind: input, shape index: {}]   ;;  %s1127_s2 = inlined_call_operand.vmem [shape: f32[10,10], index: 2, kind: input, shape index: {}]   ;;  %s1128_s3 = inlined_call_operand.vmem [shape: f32[10,1], index: 3, kind: input, shape index: {}]   ;;  %s1129_s4 = inlined_call_operand.vmem [shape: f32[10,1], index: 4, kind: input, shape index: {}]   ;;  %s1130_s5 = inlined_call_operand.<no memory space> [shape: f32[1,1], index: 5, kind: input, shape index: {}]   ;;  %s1131_s6 = inlined_call_operand.hbm [shape: f32[1,128], index: 6, kind: output, shape index: {}]  }
   0x1   :  { %v11_v0 = vstv %s1130_s5 }
   0x2   :  { %12 = vst [vmem:[#allocation3] sm:$0x1] %v11_v0 }
   0x3   :  { %v36_v1 = vld [vmem:[%s1127_s2] sm:$0xff]  ;;  %v746_v4 = vmov 1   ;;  %v747_v5 = vmov 0  }
   0x4   :  { %v34_v2 = vld [vmem:[%s1128_s3] sm:$0xff]  ;;  %666 = vset.pattern.permute.xlu2 %v746_v4  ;;  %665 = vset.pattern.permute.xlu1 %v747_v5 }
   0x5   :  { %v32_v3 = vld [vmem:[%s1126_s1] sm:$0xff]  ;;  %664 = vset.pattern.permute.xlu0 %v747_v5  ;;  %80 = vperm.xlu2 %666, %v36_v1  }
   0x6   :  { %13 = vsyncpa [#allocation5], 0  ;;  %56 = vperm.xlu1 %665, %v34_v2   ;;  %43 = vperm.xlu0 %664, %v32_v3   ;;  %v33_v6 = vld [vmem:[%s1126_s1 + $0x8] sm:$0x3]  ;;  %v748_v7 = vmov 3   ;;  %v749_v9 = vmov 5  }
   0x7   :  { %v35_v8 = vld [vmem:[%s1128_s3 + $0x8] sm:$0x3]  ;;  %v750_v10 = vmov 4   ;;  %v751_v12 = vmov 2   ;;  %v752_v13 = vmov 7   ;;  %v753_v14 = vmov 6  }
   0x8   :  { %v37_v11 = vld [vmem:[%s1127_s2 + $0x8] sm:$0x3]  ;;  %v754_v15 = vmov 8   ;;  %v755_v16 = vmov 9   ;;  %v756_v17 = vmov 0.0   ;;  %v820_v19 = vld [vmem:[%s1125_s0] sm:$0xff] }
   0x9   :  { %31 = vst [vmem:[#allocation2 + $0x8] sm:$0x3] %v756_v17  ;;  %v257_v20 = vperm.slane %v820_v19, 2  ;;  %v314_v21 = vperm.slane %v820_v19, 3  ;;  %v371_v22 = vperm.slane %v820_v19, 4  ;;  %v428_v23 = vperm.slane %v820_v19, 5 }
   0xa   :  { %v485_v24 = vperm.slane %v820_v19, 6  ;;  %v542_v25 = vperm.slane %v820_v19, 7  ;;  %v51_v0 = vperm.slane %v820_v19, 0  ;;  %v131_v2 = vperm.slane %v756_v17, 5  ;;  %s643_s15 = sshll.u32 %s1131_s6, 4  ;;  %s644_s15 = int_to_ptr.hbm [resolvable:$true] %s643_s15 }
   0xb   :  { %vm618_vm0 = vcmask 1041408  }
   0xd   :  { %667 = vset.pattern.permute.xlu2 %v748_v7 }
   0xe   :  { %68 = vperm.xlu1 %665, %v36_v1   ;;  %48 = vperm.xlu0 %664, %v33_v6  }
   0xf   :  { %102 = vperm.xlu2 %667, %v36_v1  }
  0x16   :  { %669 = vset.pattern.permute.xlu1 %v749_v9  ;;  %668 = vset.pattern.permute.xlu0 %v750_v10 }
  0x17   :  { %670 = vset.pattern.permute.xlu2 %v747_v5  ;;  %124 = vperm.xlu1 %669, %v36_v1  }
  0x18   :  { %113 = vperm.xlu0 %668, %v36_v1   ;;  %61 = vperm.xlu2 %670, %v35_v8   ;;  %v142_v8 = vperm.slane %v756_v17, 6 }
  0x1f   :  { %671 = vset.pattern.permute.xlu1 %v747_v5 }
  0x20   :  { %673 = vset.pattern.permute.xlu0 %v751_v12  ;;  %672 = vset.pattern.permute.xlu2 %v746_v4  ;;  %v87_v4 = vperm.slane %v756_v17, 1 }
  0x21   :  { %73 = vperm.xlu1 %671, %v37_v11   ;;  %91 = vperm.xlu0 %673, %v36_v1  }
  0x22   :  { %84 = vperm.xlu2 %672, %v37_v11  }
  0x29   :  { %674 = vset.pattern.permute.xlu1 %v748_v7  ;;  %678 = vset.pattern.permute.xlu0 %v752_v13  ;;  %v120_v7 = vperm.slane %v756_v17, 4 }
  0x2a   :  { %675 = vset.pattern.permute.xlu2 %v750_v10  ;;  %106 = vperm.xlu1 %674, %v37_v11  }
  0x2b   :  { %146 = vperm.xlu0 %678, %v36_v1   ;;  %117 = vperm.xlu2 %675, %v37_v11  }
  0x32   :  { %676 = vset.pattern.permute.xlu1 %v749_v9  ;;  %v98_v9 = vperm.slane %v756_v17, 2 }
  0x33   :  { %150 = vperm.xlu0 %678, %v37_v11   ;;  %677 = vset.pattern.permute.xlu2 %v753_v14 }
  0x34   :  { %128 = vperm.xlu1 %676, %v37_v11   ;;  %135 = vperm.xlu2 %677, %v36_v1  }
  0x3b   :  { %685 = vset.pattern.permute.xlu0 %v747_v5 }
  0x3c   :  { %679 = vset.pattern.permute.xlu1 %v754_v15  ;;  %680 = vset.pattern.permute.xlu2 %v755_v16 }
  0x3d   :  { %157 = vperm.xlu1 %679, %v36_v1   ;;  %168 = vperm.xlu2 %680, %v36_v1   ;;  %v905_v1 = vld [vmem:[#allocation2 + $0x8] sm:$0x3] }
  0x3e   :  { %v175_v10 = vperm.slane %v905_v1, 1 }
  0x45   :  { %681 = vset.pattern.permute.xlu1 %v751_v12  ;;  %682 = vset.pattern.permute.xlu2 %v753_v14  ;;  %v76_v12 = vperm.slane %v756_v17, 0  ;;  %v153_v14 = vperm.slane %v756_v17, 7 }
  0x46   :  { %95 = vperm.xlu1 %681, %v37_v11   ;;  %139 = vperm.xlu2 %682, %v37_v11  }
  0x4e   :  { %683 = vset.pattern.permute.xlu1 %v754_v15  ;;  %684 = vset.pattern.permute.xlu2 %v755_v16 }
  0x4f   :  { %161 = vperm.xlu1 %683, %v37_v11   ;;  %172 = vperm.xlu2 %684, %v37_v11  }
  0x57   :  { %686 = vset.pattern.permute.xlu1 %v747_v5  ;;  %687 = vset.pattern.permute.xlu2 %v747_v5  ;;  %v109_v5 = vperm.slane %v756_v17, 3 }
  0x5f   :  { %v815_v18 = vpop.permute.xlu2 %80 }
  0x60   :  { %v88_v15 = vmul.f32 %v87_v4, %v815_v18 }
  0x69   :  { %v828_v26 = vpop.permute.xlu2 %102 }
  0x6a   :  { %v110_v16 = vmul.f32 %v109_v5, %v828_v26 }
  0x72   :  { %v862_v43 = vpop.permute.xlu2 %61 }
  0x78   :  { %v830_v27 = vpop.permute.xlu1 %56  ;;  %v832_v28 = vpop.permute.xlu0 %43 }
  0x79   :  { %v258_v29 = vmul.f32 %v257_v20, %v832_v28  ;;  %v315_v30 = vmul.f32 %v314_v21, %v832_v28  ;;  %v372_v31 = vmul.f32 %v371_v22, %v832_v28  ;;  %v429_v32 = vmul.f32 %v428_v23, %v832_v28 }
  0x7a   :  { %v486_v33 = vmul.f32 %v485_v24, %v832_v28  ;;  %v543_v34 = vmul.f32 %v542_v25, %v832_v28  ;;  %v52_v6 = vmul.f32 %v51_v0, %v832_v28 }
  0x7b   :  { %v841_v35 = vadd.f32 %v258_v29, %v830_v27  ;;  %v844_v36 = vadd.f32 %v315_v30, %v830_v27  ;;  %v847_v37 = vadd.f32 %v372_v31, %v830_v27  ;;  %v850_v38 = vadd.f32 %v429_v32, %v830_v27 }
  0x7c   :  { %v853_v39 = vadd.f32 %v486_v33, %v830_v27  ;;  %v856_v40 = vadd.f32 %v543_v34, %v830_v27  ;;  %v890_v57 = vpop.permute.xlu2 %84  ;;  %v164_v29 = vperm.slane %v905_v1, 0 }
  0x7e   :  { %1132 = vst [vmem:[#allocation7_spill] sm:$0xff] %v856_v40 }
  0x80   :  { %v858_v41 = vpop.permute.xlu1 %68  ;;  %v860_v42 = vpop.permute.xlu0 %48 }
  0x81   :  { %v259_v44 = vmul.f32 %v257_v20, %v860_v42  ;;  %v316_v45 = vmul.f32 %v314_v21, %v860_v42  ;;  %v373_v46 = vmul.f32 %v371_v22, %v860_v42  ;;  %v430_v47 = vmul.f32 %v428_v23, %v860_v42 }
  0x82   :  { %v487_v48 = vmul.f32 %v485_v24, %v860_v42  ;;  %v544_v50 = vmul.f32 %v542_v25, %v860_v42  ;;  %v64_v20 = vadd.f32 %v830_v27, %v52_v6  ;;  %v77_v17 = vmul.f32 %v76_v12, %v858_v41 }
  0x83   :  { %v870_v49 = vadd.f32 %v259_v44, %v862_v43  ;;  %v874_v51 = vadd.f32 %v316_v45, %v862_v43  ;;  %v877_v52 = vadd.f32 %v373_v46, %v862_v43  ;;  %v880_v53 = vadd.f32 %v430_v47, %v862_v43 }
  0x84   :  { %v883_v54 = vadd.f32 %v487_v48, %v862_v43  ;;  %v886_v55 = vadd.f32 %v544_v50, %v862_v43  ;;  %v178_v32 = vadd.f32 %v110_v16, %v64_v20 }
  0x85   :  { %v894_v59 = vpop.permute.xlu2 %117 }
  0x86   :  { %1133 = vst [vmem:[#allocation8_spill] sm:$0xff] %v886_v55 }
  0x89   :  { %v888_v56 = vpop.permute.xlu1 %124 }
  0x8a   :  { %v896_v60 = vpop.permute.xlu0 %113  ;;  %v132_v13 = vmul.f32 %v131_v2, %v888_v56 }
  0x8b   :  { %v121_v21 = vmul.f32 %v120_v7, %v896_v60 }
  0x8c   :  { %v182_v30 = vadd.f32 %v132_v13, %v88_v15  ;;  %v200_v13 = vperm.slane %v820_v19, 1  ;;  %v53_v15 = vmul.f32 %v51_v0, %v860_v42  ;;  %v89_v0 = vmul.f32 %v87_v4, %v890_v57 }
  0x8d   :  { %v180_v34 = vadd.f32 %v121_v21, %v77_v17 }
  0x8e   :  { %v900_v62 = vpop.permute.xlu2 %135  ;;  %v201_v19 = vmul.f32 %v200_v13, %v832_v28 }
  0x8f   :  { %v143_v23 = vmul.f32 %v142_v8, %v900_v62 }
  0x90   :  { %v203_v4 = vadd.f32 %v201_v19, %v830_v27 }
  0x93   :  { %v892_v58 = vpop.permute.xlu1 %73  ;;  %v902_v63 = vpop.permute.xlu0 %91 }
  0x94   :  { %v99_v24 = vmul.f32 %v98_v9, %v902_v63  ;;  %v78_v17 = vmul.f32 %v76_v12, %v892_v58 }
  0x96   :  { %v184_v44 = vadd.f32 %v143_v23, %v99_v24 }
  0x97   :  { %v917_v11 = vpop.permute.xlu2 %168 }
  0x98   :  { %v176_v25 = vmul.f32 %v175_v10, %v917_v11 }
  0x9a   :  { %v190_v45 = vadd.f32 %v182_v30, %v176_v25 }
  0x9c   :  { %v898_v61 = vpop.permute.xlu1 %106  ;;  %v194_v6 = vadd.f32 %v190_v45, %v184_v44 }
  0x9d   :  { %v926_v22 = vpop.permute.xlu0 %146  ;;  %v111_v30 = vmul.f32 %v109_v5, %v898_v61 }
  0x9e   :  { %v154_v31 = vmul.f32 %v153_v14, %v926_v22 }
  0xa0   :  { %v186_v47 = vadd.f32 %v178_v32, %v154_v31  ;;  %v937_v48 = vpop.permute.xlu2 %139  ;;  %v202_v32 = vmul.f32 %v200_v13, %v860_v42 }
  0xa1   :  { %v144_v20 = vmul.f32 %v142_v8, %v937_v48  ;;  %v65_v8 = vadd.f32 %v862_v43, %v53_v15 }
  0xa3   :  { %v179_v5 = vadd.f32 %v111_v30, %v65_v8 }
  0xa5   :  { %v946_v21 = vpop.permute.xlu0 %150 }
  0xa6   :  { %v908_v3 = vpop.permute.xlu1 %128 }
  0xa7   :  { %v133_v23 = vmul.f32 %v131_v2, %v908_v3  ;;  %v155_v2 = vmul.f32 %v153_v14, %v946_v21 }
  0xa9   :  { %v943_v16 = vpop.permute.xlu2 %172  ;;  %v187_v42 = vadd.f32 %v179_v5, %v155_v2 }
  0xaa   :  { %v177_v31 = vmul.f32 %v175_v10, %v943_v16 }
  0xaf   :  { %v934_v33 = vpop.permute.xlu1 %157 }
  0xb0   :  { %v165_v46 = vmul.f32 %v164_v29, %v934_v33 }
  0xb2   :  { %v188_v50 = vadd.f32 %v180_v34, %v165_v46  ;;  %v183_v34 = vadd.f32 %v133_v23, %v89_v0 }
  0xb4   :  { %v192_v55 = vadd.f32 %v188_v50, %v186_v47  ;;  %v191_v46 = vadd.f32 %v183_v34, %v177_v31  ;;  %v204_v47 = vadd.f32 %v202_v32, %v862_v43 }
  0xb6   :  { %v196_v1 = vadd.f32 %v194_v6, %v192_v55  ;;  %v122_v55 = vmul.f32 %v120_v7, %v894_v59 }
  0xb8   :  { %688 = vtanh.f32 %v196_v1  ;;  %v939_v40 = vpop.permute.xlu1 %95  ;;  %v181_v45 = vadd.f32 %v122_v55, %v78_v17 }
  0xb9   :  { %v100_v24 = vmul.f32 %v98_v9, %v939_v40 }
  0xbb   :  { %v185_v44 = vadd.f32 %v144_v20, %v100_v24 }
  0xbd   :  { %v195_v6 = vadd.f32 %v191_v46, %v185_v44 }
  0xbe   :  { %v689_v25 = vpop.eup %688 }
  0xbf   :  { %v214_v9 = vperm.slane %v689_v25, 3  ;;  %v226_v12 = vperm.slane %v689_v25, 7  ;;  %v205_v55 = vperm.slane %v689_v25, 0  ;;  %v208_v17 = vperm.slane %v689_v25, 1 }
  0xc0   :  { %v217_v30 = vperm.slane %v689_v25, 4  ;;  %v220_v43 = vperm.slane %v689_v25, 5  ;;  %v211_v19 = vperm.slane %v689_v25, 2  ;;  %v223_v0 = vperm.slane %v689_v25, 6 }
  0xc1   :  { %v959_v7 = vpop.permute.xlu1 %161  ;;  %v215_v10 = vmul.f32 %v214_v9, %v828_v26  ;;  %v216_v14 = vmul.f32 %v214_v9, %v898_v61  ;;  %v227_v1 = vmul.f32 %v226_v12, %v926_v22  ;;  %v228_v15 = vmul.f32 %v226_v12, %v946_v21 }
  0xc2   :  { %v166_v28 = vmul.f32 %v164_v29, %v959_v7  ;;  %v206_v31 = vmul.f32 %v205_v55, %v858_v41  ;;  %v207_v8 = vmul.f32 %v205_v55, %v892_v58  ;;  %v209_v32 = vmul.f32 %v208_v17, %v815_v18 }
  0xc3   :  { %v235_v20 = vadd.f32 %v215_v10, %v203_v4  ;;  %v236_v23 = vadd.f32 %v216_v14, %v204_v47  ;;  %v210_v2 = vmul.f32 %v208_v17, %v890_v57  ;;  %v218_v9 = vmul.f32 %v217_v30, %v896_v60 }
  0xc4   :  { %v189_v50 = vadd.f32 %v181_v45, %v166_v28  ;;  %v219_v34 = vmul.f32 %v217_v30, %v894_v59  ;;  %v221_v44 = vmul.f32 %v220_v43, %v888_v56  ;;  %v222_v12 = vmul.f32 %v220_v43, %v908_v3  ;;  %v604_v43 = vld [vmem:[%s1129_s4] sm:$0xff] }
  0xc5   :  { %v243_v24 = vadd.f32 %v235_v20, %v227_v1  ;;  %v244_v27 = vadd.f32 %v236_v23, %v228_v15  ;;  %v212_v5 = vmul.f32 %v211_v19, %v902_v63  ;;  %v213_v25 = vmul.f32 %v211_v19, %v939_v40  ;;  %v605_v19 = vld [vmem:[%s1129_s4 + $0x8] sm:$0x3]  ;;  %608 = vperm.xlu1 %686, %v604_v43   ;;  %s757_s4 = smov [#allocation4]  }
  0xc6   :  { %v193_v13 = vadd.f32 %v189_v50, %v187_v42  ;;  %v224_v28 = vmul.f32 %v223_v0, %v900_v62  ;;  %v225_v4 = vmul.f32 %v223_v0, %v937_v48  ;;  %v237_v47 = vadd.f32 %v218_v9, %v206_v31  ;;  %613 = vperm.xlu0 %685, %v605_v19   ;;  %s641_s12 = sshll.u32 %s757_s4, 4  ;;  %s642_s12 = int_to_ptr.vmem [resolvable:$true] %s641_s12 }
  0xc7   :  { %v238_v42 = vadd.f32 %v219_v34, %v207_v8  ;;  %v239_v50 = vadd.f32 %v221_v44, %v209_v32  ;;  %v240_v14 = vadd.f32 %v222_v12, %v210_v2 }
  0xc8   :  { %v197_v29 = vadd.f32 %v195_v6, %v193_v13  ;;  %v241_v20 = vadd.f32 %v224_v28, %v212_v5  ;;  %v242_v23 = vadd.f32 %v225_v4, %v213_v25 }
  0xca   :  { %690 = vtanh.f32 %v197_v29 }
  0xd0   :  { %v691_v45 = vpop.eup %690 }
  0xd1   :  { %v229_v46 = vperm.slane %v691_v45, 0  ;;  %v232_v10 = vperm.slane %v691_v45, 1 }
  0xd3   :  { %v230_v6 = vmul.f32 %v229_v46, %v934_v33  ;;  %v231_v1 = vmul.f32 %v229_v46, %v959_v7  ;;  %v233_v13 = vmul.f32 %v232_v10, %v917_v11  ;;  %v234_v15 = vmul.f32 %v232_v10, %v943_v16 }
  0xd5   :  { %v245_v29 = vadd.f32 %v237_v47, %v230_v6  ;;  %v246_v55 = vadd.f32 %v238_v42, %v231_v1  ;;  %v247_v17 = vadd.f32 %v239_v50, %v233_v13  ;;  %v248_v30 = vadd.f32 %v240_v14, %v234_v15 }
  0xd7   :  { %v249_v0 = vadd.f32 %v245_v29, %v243_v24  ;;  %v250_v31 = vadd.f32 %v246_v55, %v244_v27  ;;  %v251_v8 = vadd.f32 %v247_v17, %v241_v20  ;;  %v252_v32 = vadd.f32 %v248_v30, %v242_v23 }
  0xd9   :  { %v253_v2 = vadd.f32 %v251_v8, %v249_v0  ;;  %v254_v9 = vadd.f32 %v252_v32, %v250_v31 }
  0xdb   :  { %692 = vtanh.f32 %v253_v2 }
  0xdc   :  { %694 = vtanh.f32 %v254_v9 }
  0xe1   :  { %v693_v34 = vpop.eup %692 }
  0xe2   :  { %v262_v44 = vperm.slane %v693_v34, 0  ;;  %v265_v12 = vperm.slane %v693_v34, 1  ;;  %v268_v45 = vperm.slane %v693_v34, 2  ;;  %v271_v5 = vperm.slane %v693_v34, 3  ;;  %v695_v42 = vpop.eup %694 }
  0xe3   :  { %v274_v25 = vperm.slane %v693_v34, 4  ;;  %v277_v28 = vperm.slane %v693_v34, 5  ;;  %v280_v4 = vperm.slane %v693_v34, 6  ;;  %v283_v46 = vperm.slane %v693_v34, 7 }
  0xe4   :  { %v263_v10 = vmul.f32 %v262_v44, %v858_v41  ;;  %v264_v24 = vmul.f32 %v262_v44, %v892_v58  ;;  %v266_v27 = vmul.f32 %v265_v12, %v815_v18  ;;  %v267_v47 = vmul.f32 %v265_v12, %v890_v57 }
  0xe5   :  { %v269_v50 = vmul.f32 %v268_v45, %v902_v63  ;;  %v270_v14 = vmul.f32 %v268_v45, %v939_v40  ;;  %v272_v6 = vmul.f32 %v271_v5, %v828_v26  ;;  %v273_v1 = vmul.f32 %v271_v5, %v898_v61 }
  0xe6   :  { %v275_v13 = vmul.f32 %v274_v25, %v896_v60  ;;  %v276_v15 = vmul.f32 %v274_v25, %v894_v59  ;;  %v278_v20 = vmul.f32 %v277_v28, %v888_v56  ;;  %v279_v23 = vmul.f32 %v277_v28, %v908_v3 }
  0xe7   :  { %v281_v29 = vmul.f32 %v280_v4, %v900_v62  ;;  %v282_v55 = vmul.f32 %v280_v4, %v937_v48  ;;  %v284_v17 = vmul.f32 %v283_v46, %v926_v22  ;;  %v285_v30 = vmul.f32 %v283_v46, %v946_v21 }
  0xe8   :  { %v286_v43 = vperm.slane %v695_v42, 0  ;;  %v289_v19 = vperm.slane %v695_v42, 1  ;;  %v292_v0 = vadd.f32 %v272_v6, %v841_v35  ;;  %v293_v31 = vadd.f32 %v273_v1, %v870_v49 }
  0xe9   :  { %v294_v8 = vadd.f32 %v275_v13, %v263_v10  ;;  %v295_v32 = vadd.f32 %v276_v15, %v264_v24  ;;  %v296_v2 = vadd.f32 %v278_v20, %v266_v27  ;;  %v297_v9 = vadd.f32 %v279_v23, %v267_v47 }
  0xea   :  { %v287_v34 = vmul.f32 %v286_v43, %v934_v33  ;;  %v288_v44 = vmul.f32 %v286_v43, %v959_v7  ;;  %v290_v12 = vmul.f32 %v289_v19, %v917_v11  ;;  %v291_v45 = vmul.f32 %v289_v19, %v943_v16 }
  0xeb   :  { %v298_v5 = vadd.f32 %v281_v29, %v269_v50  ;;  %v299_v25 = vadd.f32 %v282_v55, %v270_v14  ;;  %v300_v28 = vadd.f32 %v292_v0, %v284_v17  ;;  %v301_v4 = vadd.f32 %v293_v31, %v285_v30 }
  0xec   :  { %v302_v46 = vadd.f32 %v294_v8, %v287_v34  ;;  %v303_v35 = vadd.f32 %v295_v32, %v288_v44  ;;  %v304_v42 = vadd.f32 %v296_v2, %v290_v12  ;;  %v305_v49 = vadd.f32 %v297_v9, %v291_v45  ;;  %v627_v34 = vld [vmem:[#allocation3] sm:$0x1] }
  0xed   :  { %630 = vperm.xlu2 %687, %v627_v34  }
  0xee   :  { %v306_v10 = vadd.f32 %v302_v46, %v300_v28  ;;  %v307_v24 = vadd.f32 %v303_v35, %v301_v4  ;;  %v308_v27 = vadd.f32 %v304_v42, %v298_v5  ;;  %v309_v47 = vadd.f32 %v305_v49, %v299_v25 }
  0xf0   :  { %v310_v6 = vadd.f32 %v308_v27, %v306_v10  ;;  %v311_v1 = vadd.f32 %v309_v47, %v307_v24 }
  0xf2   :  { %696 = vtanh.f32 %v310_v6 }
  0xf3   :  { %698 = vtanh.f32 %v311_v1 }
  0xf8   :  { %v697_v13 = vpop.eup %696 }
  0xf9   :  { %v319_v15 = vperm.slane %v697_v13, 0  ;;  %v322_v20 = vperm.slane %v697_v13, 1  ;;  %v325_v23 = vperm.slane %v697_v13, 2  ;;  %v328_v50 = vperm.slane %v697_v13, 3  ;;  %v699_v31 = vpop.eup %698 }
  0xfa   :  { %v331_v14 = vperm.slane %v697_v13, 4  ;;  %v334_v29 = vperm.slane %v697_v13, 5  ;;  %v337_v55 = vperm.slane %v697_v13, 6  ;;  %v340_v17 = vperm.slane %v697_v13, 7 }
  0xfb   :  { %v320_v30 = vmul.f32 %v319_v15, %v858_v41  ;;  %v321_v43 = vmul.f32 %v319_v15, %v892_v58  ;;  %v323_v19 = vmul.f32 %v322_v20, %v815_v18  ;;  %v324_v0 = vmul.f32 %v322_v20, %v890_v57 }
  0xfc   :  { %v326_v8 = vmul.f32 %v325_v23, %v902_v63  ;;  %v327_v32 = vmul.f32 %v325_v23, %v939_v40  ;;  %v329_v2 = vmul.f32 %v328_v50, %v828_v26  ;;  %v330_v9 = vmul.f32 %v328_v50, %v898_v61 }
  0xfd   :  { %v332_v44 = vmul.f32 %v331_v14, %v896_v60  ;;  %v333_v12 = vmul.f32 %v331_v14, %v894_v59  ;;  %v335_v45 = vmul.f32 %v334_v29, %v888_v56  ;;  %v336_v5 = vmul.f32 %v334_v29, %v908_v3 }
  0xfe   :  { %v338_v25 = vmul.f32 %v337_v55, %v900_v62  ;;  %v339_v28 = vmul.f32 %v337_v55, %v937_v48  ;;  %v341_v4 = vmul.f32 %v340_v17, %v926_v22  ;;  %v342_v46 = vmul.f32 %v340_v17, %v946_v21 }
  0xff   :  { %v343_v35 = vperm.slane %v699_v31, 0  ;;  %v346_v42 = vperm.slane %v699_v31, 1  ;;  %v349_v49 = vadd.f32 %v329_v2, %v844_v36  ;;  %v350_v10 = vadd.f32 %v330_v9, %v874_v51 }
 0x100   :  { %v351_v24 = vadd.f32 %v332_v44, %v320_v30  ;;  %v352_v27 = vadd.f32 %v333_v12, %v321_v43  ;;  %v353_v47 = vadd.f32 %v335_v45, %v323_v19  ;;  %v354_v6 = vadd.f32 %v336_v5, %v324_v0 }
 0x101   :  { %v344_v1 = vmul.f32 %v343_v35, %v934_v33  ;;  %v345_v13 = vmul.f32 %v343_v35, %v959_v7  ;;  %v347_v15 = vmul.f32 %v346_v42, %v917_v11  ;;  %v348_v20 = vmul.f32 %v346_v42, %v943_v16 }
 0x102   :  { %v355_v23 = vadd.f32 %v338_v25, %v326_v8  ;;  %v356_v50 = vadd.f32 %v339_v28, %v327_v32  ;;  %v357_v14 = vadd.f32 %v349_v49, %v341_v4  ;;  %v358_v29 = vadd.f32 %v350_v10, %v342_v46 }
 0x103   :  { %v359_v55 = vadd.f32 %v351_v24, %v344_v1  ;;  %v360_v36 = vadd.f32 %v352_v27, %v345_v13  ;;  %v361_v17 = vadd.f32 %v353_v47, %v347_v15  ;;  %v362_v51 = vadd.f32 %v354_v6, %v348_v20 }
 0x105   :  { %v363_v30 = vadd.f32 %v359_v55, %v357_v14  ;;  %v364_v43 = vadd.f32 %v360_v36, %v358_v29  ;;  %v365_v19 = vadd.f32 %v361_v17, %v355_v23  ;;  %v366_v0 = vadd.f32 %v362_v51, %v356_v50 }
 0x107   :  { %v367_v31 = vadd.f32 %v365_v19, %v363_v30  ;;  %v368_v2 = vadd.f32 %v366_v0, %v364_v43 }
 0x109   :  { %700 = vtanh.f32 %v367_v31 }
 0x10a   :  { %702 = vtanh.f32 %v368_v2 }
 0x10f   :  { %v701_v9 = vpop.eup %700 }
 0x110   :  { %v376_v34 = vperm.slane %v701_v9, 0  ;;  %v379_v44 = vperm.slane %v701_v9, 1  ;;  %v382_v12 = vperm.slane %v701_v9, 2  ;;  %v385_v8 = vperm.slane %v701_v9, 3  ;;  %v703_v42 = vpop.eup %702 }
 0x111   :  { %v388_v32 = vperm.slane %v701_v9, 4  ;;  %v391_v45 = vperm.slane %v701_v9, 5  ;;  %v394_v5 = vperm.slane %v701_v9, 6  ;;  %v397_v25 = vperm.slane %v701_v9, 7 }
 0x112   :  { %v377_v28 = vmul.f32 %v376_v34, %v858_v41  ;;  %v378_v4 = vmul.f32 %v376_v34, %v892_v58  ;;  %v380_v46 = vmul.f32 %v379_v44, %v815_v18  ;;  %v381_v35 = vmul.f32 %v379_v44, %v890_v57 }
 0x113   :  { %v383_v49 = vmul.f32 %v382_v12, %v902_v63  ;;  %v384_v10 = vmul.f32 %v382_v12, %v939_v40  ;;  %v386_v24 = vmul.f32 %v385_v8, %v828_v26  ;;  %v387_v27 = vmul.f32 %v385_v8, %v898_v61 }
 0x114   :  { %v389_v47 = vmul.f32 %v388_v32, %v896_v60  ;;  %v390_v6 = vmul.f32 %v388_v32, %v894_v59  ;;  %v392_v1 = vmul.f32 %v391_v45, %v888_v56  ;;  %v393_v13 = vmul.f32 %v391_v45, %v908_v3 }
 0x115   :  { %v395_v15 = vmul.f32 %v394_v5, %v900_v62  ;;  %v396_v20 = vmul.f32 %v394_v5, %v937_v48  ;;  %v398_v23 = vmul.f32 %v397_v25, %v926_v22  ;;  %v399_v50 = vmul.f32 %v397_v25, %v946_v21 }
 0x116   :  { %v400_v14 = vperm.slane %v703_v42, 0  ;;  %v403_v29 = vperm.slane %v703_v42, 1  ;;  %v406_v55 = vadd.f32 %v386_v24, %v847_v37  ;;  %v407_v36 = vadd.f32 %v387_v27, %v877_v52 }
 0x117   :  { %v408_v17 = vadd.f32 %v389_v47, %v377_v28  ;;  %v409_v51 = vadd.f32 %v390_v6, %v378_v4  ;;  %v410_v30 = vadd.f32 %v392_v1, %v380_v46  ;;  %v411_v43 = vadd.f32 %v393_v13, %v381_v35 }
 0x118   :  { %v401_v19 = vmul.f32 %v400_v14, %v934_v33  ;;  %v402_v0 = vmul.f32 %v400_v14, %v959_v7  ;;  %v404_v31 = vmul.f32 %v403_v29, %v917_v11  ;;  %v405_v2 = vmul.f32 %v403_v29, %v943_v16 }
 0x119   :  { %v412_v9 = vadd.f32 %v395_v15, %v383_v49  ;;  %v413_v34 = vadd.f32 %v396_v20, %v384_v10  ;;  %v414_v44 = vadd.f32 %v406_v55, %v398_v23  ;;  %v415_v12 = vadd.f32 %v407_v36, %v399_v50 }
 0x11a   :  { %v416_v8 = vadd.f32 %v408_v17, %v401_v19  ;;  %v417_v37 = vadd.f32 %v409_v51, %v402_v0  ;;  %v418_v32 = vadd.f32 %v410_v30, %v404_v31  ;;  %v419_v52 = vadd.f32 %v411_v43, %v405_v2 }
 0x11c   :  { %v420_v45 = vadd.f32 %v416_v8, %v414_v44  ;;  %v421_v5 = vadd.f32 %v417_v37, %v415_v12  ;;  %v422_v25 = vadd.f32 %v418_v32, %v412_v9  ;;  %v423_v28 = vadd.f32 %v419_v52, %v413_v34 }
 0x11e   :  { %v424_v4 = vadd.f32 %v422_v25, %v420_v45  ;;  %v425_v46 = vadd.f32 %v423_v28, %v421_v5 }
 0x120   :  { %704 = vtanh.f32 %v424_v4 }
 0x121   :  { %706 = vtanh.f32 %v425_v46 }
 0x126   :  { %v705_v35 = vpop.eup %704 }
 0x127   :  { %v433_v42 = vperm.slane %v705_v35, 0  ;;  %v436_v24 = vperm.slane %v705_v35, 1  ;;  %v439_v27 = vperm.slane %v705_v35, 2  ;;  %v442_v49 = vperm.slane %v705_v35, 3  ;;  %v707_v50 = vpop.eup %706 }
 0x128   :  { %v445_v10 = vperm.slane %v705_v35, 4  ;;  %v448_v47 = vperm.slane %v705_v35, 5  ;;  %v451_v6 = vperm.slane %v705_v35, 6  ;;  %v454_v1 = vperm.slane %v705_v35, 7 }
 0x129   :  { %v434_v13 = vmul.f32 %v433_v42, %v858_v41  ;;  %v435_v15 = vmul.f32 %v433_v42, %v892_v58  ;;  %v437_v20 = vmul.f32 %v436_v24, %v815_v18  ;;  %v438_v23 = vmul.f32 %v436_v24, %v890_v57 }
 0x12a   :  { %v440_v14 = vmul.f32 %v439_v27, %v902_v63  ;;  %v441_v29 = vmul.f32 %v439_v27, %v939_v40  ;;  %v443_v55 = vmul.f32 %v442_v49, %v828_v26  ;;  %v444_v36 = vmul.f32 %v442_v49, %v898_v61 }
 0x12b   :  { %v446_v17 = vmul.f32 %v445_v10, %v896_v60  ;;  %v447_v51 = vmul.f32 %v445_v10, %v894_v59  ;;  %v449_v30 = vmul.f32 %v448_v47, %v888_v56  ;;  %v450_v43 = vmul.f32 %v448_v47, %v908_v3 }
 0x12c   :  { %v452_v19 = vmul.f32 %v451_v6, %v900_v62  ;;  %v453_v0 = vmul.f32 %v451_v6, %v937_v48  ;;  %v455_v31 = vmul.f32 %v454_v1, %v926_v22  ;;  %v456_v2 = vmul.f32 %v454_v1, %v946_v21 }
 0x12d   :  { %v457_v9 = vperm.slane %v707_v50, 0  ;;  %v460_v34 = vperm.slane %v707_v50, 1  ;;  %v463_v44 = vadd.f32 %v443_v55, %v850_v38  ;;  %v464_v12 = vadd.f32 %v444_v36, %v880_v53 }
 0x12e   :  { %v465_v8 = vadd.f32 %v446_v17, %v434_v13  ;;  %v466_v37 = vadd.f32 %v447_v51, %v435_v15  ;;  %v467_v32 = vadd.f32 %v449_v30, %v437_v20  ;;  %v468_v52 = vadd.f32 %v450_v43, %v438_v23 }
 0x12f   :  { %v458_v45 = vmul.f32 %v457_v9, %v934_v33  ;;  %v459_v5 = vmul.f32 %v457_v9, %v959_v7  ;;  %v461_v25 = vmul.f32 %v460_v34, %v917_v11  ;;  %v462_v28 = vmul.f32 %v460_v34, %v943_v16 }
 0x130   :  { %v469_v4 = vadd.f32 %v452_v19, %v440_v14  ;;  %v470_v46 = vadd.f32 %v453_v0, %v441_v29  ;;  %v471_v35 = vadd.f32 %v463_v44, %v455_v31  ;;  %v472_v42 = vadd.f32 %v464_v12, %v456_v2 }
 0x131   :  { %v473_v24 = vadd.f32 %v465_v8, %v458_v45  ;;  %v474_v38 = vadd.f32 %v466_v37, %v459_v5  ;;  %v475_v27 = vadd.f32 %v467_v32, %v461_v25  ;;  %v476_v53 = vadd.f32 %v468_v52, %v462_v28 }
 0x133   :  { %v477_v49 = vadd.f32 %v473_v24, %v471_v35  ;;  %v478_v10 = vadd.f32 %v474_v38, %v472_v42  ;;  %v479_v47 = vadd.f32 %v475_v27, %v469_v4  ;;  %v480_v6 = vadd.f32 %v476_v53, %v470_v46 }
 0x135   :  { %v481_v1 = vadd.f32 %v479_v47, %v477_v49  ;;  %v482_v13 = vadd.f32 %v480_v6, %v478_v10 }
 0x137   :  { %708 = vtanh.f32 %v481_v1 }
 0x138   :  { %710 = vtanh.f32 %v482_v13 }
 0x13d   :  { %v709_v15 = vpop.eup %708 }
 0x13e   :  { %v490_v20 = vperm.slane %v709_v15, 0  ;;  %v493_v23 = vperm.slane %v709_v15, 1  ;;  %v496_v50 = vperm.slane %v709_v15, 2  ;;  %v499_v14 = vperm.slane %v709_v15, 3  ;;  %v711_v51 = vpop.eup %710 }
 0x13f   :  { %v502_v29 = vperm.slane %v709_v15, 4  ;;  %v505_v55 = vperm.slane %v709_v15, 5  ;;  %v508_v36 = vperm.slane %v709_v15, 6  ;;  %v511_v17 = vperm.slane %v709_v15, 7 }
 0x140   :  { %v491_v30 = vmul.f32 %v490_v20, %v858_v41  ;;  %v492_v43 = vmul.f32 %v490_v20, %v892_v58  ;;  %v494_v19 = vmul.f32 %v493_v23, %v815_v18  ;;  %v497_v0 = vmul.f32 %v496_v50, %v902_v63 }
 0x141   :  { %v500_v31 = vmul.f32 %v499_v14, %v828_v26  ;;  %v501_v2 = vmul.f32 %v499_v14, %v898_v61  ;;  %v503_v9 = vmul.f32 %v502_v29, %v896_v60  ;;  %v504_v34 = vmul.f32 %v502_v29, %v894_v59 }
 0x142   :  { %v506_v44 = vmul.f32 %v505_v55, %v888_v56  ;;  %v509_v12 = vmul.f32 %v508_v36, %v900_v62  ;;  %v512_v8 = vmul.f32 %v511_v17, %v926_v22  ;;  %v513_v37 = vmul.f32 %v511_v17, %v946_v21 }
 0x143   :  { %v514_v32 = vperm.slane %v711_v51, 0  ;;  %v517_v52 = vperm.slane %v711_v51, 1  ;;  %v520_v45 = vadd.f32 %v500_v31, %v853_v39  ;;  %v521_v5 = vadd.f32 %v501_v2, %v883_v54 }
 0x144   :  { %v522_v25 = vadd.f32 %v503_v9, %v491_v30  ;;  %v523_v28 = vadd.f32 %v504_v34, %v492_v43  ;;  %v524_v4 = vadd.f32 %v506_v44, %v494_v19  ;;  %v526_v46 = vadd.f32 %v509_v12, %v497_v0 }
 0x145   :  { %v515_v35 = vmul.f32 %v514_v32, %v934_v33  ;;  %v516_v42 = vmul.f32 %v514_v32, %v959_v7  ;;  %v518_v24 = vmul.f32 %v517_v52, %v917_v11  ;;  %v528_v38 = vadd.f32 %v520_v45, %v512_v8 }
 0x146   :  { %v529_v27 = vadd.f32 %v521_v5, %v513_v37  ;;  %v495_v53 = vmul.f32 %v493_v23, %v890_v57  ;;  %v498_v49 = vmul.f32 %v496_v50, %v939_v40  ;;  %v507_v39 = vmul.f32 %v505_v55, %v908_v3 }
 0x147   :  { %v530_v10 = vadd.f32 %v522_v25, %v515_v35  ;;  %v531_v54 = vadd.f32 %v523_v28, %v516_v42  ;;  %v532_v47 = vadd.f32 %v524_v4, %v518_v24  ;;  %v510_v6 = vmul.f32 %v508_v36, %v937_v48  ;;  %v1134_v4 = vld [vmem:[#allocation7_spill] sm:$0xff] }
 0x148   :  { %v519_v1 = vmul.f32 %v517_v52, %v943_v16  ;;  %v525_v13 = vadd.f32 %v507_v39, %v495_v53 }
 0x149   :  { %v534_v15 = vadd.f32 %v530_v10, %v528_v38  ;;  %v535_v20 = vadd.f32 %v531_v54, %v529_v27  ;;  %v536_v14 = vadd.f32 %v532_v47, %v526_v46  ;;  %v527_v29 = vadd.f32 %v510_v6, %v498_v49 }
 0x14a   :  { %v533_v17 = vadd.f32 %v525_v13, %v519_v1 }
 0x14b   :  { %v538_v51 = vadd.f32 %v536_v14, %v534_v15 }
 0x14c   :  { %v537_v30 = vadd.f32 %v533_v17, %v527_v29 }
 0x14d   :  { %712 = vtanh.f32 %v538_v51 }
 0x14e   :  { %v539_v23 = vadd.f32 %v537_v30, %v535_v20  ;;  %v614_v20 = vpop.permute.xlu0 %613 }
 0x150   :  { %714 = vtanh.f32 %v539_v23 }
 0x153   :  { %v713_v50 = vpop.eup %712 }
 0x154   :  { %v547_v55 = vperm.slane %v713_v50, 0  ;;  %v550_v43 = vperm.slane %v713_v50, 1  ;;  %v553_v19 = vperm.slane %v713_v50, 2  ;;  %v556_v0 = vperm.slane %v713_v50, 3 }
 0x155   :  { %v559_v31 = vperm.slane %v713_v50, 4  ;;  %v562_v36 = vperm.slane %v713_v50, 5  ;;  %v565_v2 = vperm.slane %v713_v50, 6  ;;  %v568_v9 = vperm.slane %v713_v50, 7 }
 0x156   :  { %v715_v34 = vpop.eup %714  ;;  %v548_v44 = vmul.f32 %v547_v55, %v858_v41  ;;  %v551_v12 = vmul.f32 %v550_v43, %v815_v18  ;;  %v554_v8 = vmul.f32 %v553_v19, %v902_v63  ;;  %v557_v37 = vmul.f32 %v556_v0, %v828_v26 }
 0x157   :  { %v560_v32 = vmul.f32 %v559_v31, %v896_v60  ;;  %v563_v52 = vmul.f32 %v562_v36, %v888_v56  ;;  %v566_v45 = vmul.f32 %v565_v2, %v900_v62  ;;  %v569_v5 = vmul.f32 %v568_v9, %v926_v22 }
 0x158   :  { %v571_v25 = vperm.slane %v715_v34, 0  ;;  %v574_v28 = vperm.slane %v715_v34, 1  ;;  %v577_v46 = vadd.f32 %v557_v37, %v1134_v4  ;;  %v549_v41 = vmul.f32 %v547_v55, %v892_v58  ;;  %v631_v55 = vpop.permute.xlu2 %630 }
 0x159   :  { %v579_v35 = vadd.f32 %v560_v32, %v548_v44  ;;  %v581_v18 = vadd.f32 %v563_v52, %v551_v12  ;;  %v583_v42 = vadd.f32 %v566_v45, %v554_v8  ;;  %v552_v63 = vmul.f32 %v550_v43, %v890_v57 }
 0x15a   :  { %v572_v26 = vmul.f32 %v571_v25, %v934_v33  ;;  %v575_v60 = vmul.f32 %v574_v28, %v917_v11  ;;  %v585_v56 = vadd.f32 %v577_v46, %v569_v5  ;;  %v555_v62 = vmul.f32 %v553_v19, %v939_v40  ;;  %v1135_v11 = vld [vmem:[#allocation8_spill] sm:$0xff] }
 0x15b   :  { %v558_v22 = vmul.f32 %v556_v0, %v898_v61  ;;  %v561_v24 = vmul.f32 %v559_v31, %v894_v59  ;;  %v564_v38 = vmul.f32 %v562_v36, %v908_v3  ;;  %v567_v58 = vmul.f32 %v565_v2, %v937_v48 }
 0x15c   :  { %v587_v27 = vadd.f32 %v579_v35, %v572_v26  ;;  %v589_v53 = vadd.f32 %v581_v18, %v575_v60  ;;  %v570_v49 = vmul.f32 %v568_v9, %v946_v21  ;;  %v573_v57 = vmul.f32 %v571_v25, %v959_v7  ;;  %v609_v7 = vpop.permute.xlu1 %608 }
 0x15d   :  { %v576_v33 = vmul.f32 %v574_v28, %v943_v16  ;;  %v578_v39 = vadd.f32 %v558_v22, %v1135_v11  ;;  %v580_v10 = vadd.f32 %v561_v24, %v549_v41  ;;  %v582_v40 = vadd.f32 %v564_v38, %v552_v63 }
 0x15e   :  { %v591_v54 = vadd.f32 %v587_v27, %v585_v56  ;;  %v593_v61 = vadd.f32 %v589_v53, %v583_v42  ;;  %v584_v47 = vadd.f32 %v567_v58, %v555_v62  ;;  %v633_v0 = vperm.slane %v631_v55, 0 }
 0x15f   :  { %v586_v59 = vadd.f32 %v578_v39, %v570_v49  ;;  %v588_v6 = vadd.f32 %v580_v10, %v573_v57  ;;  %v590_v3 = vadd.f32 %v582_v40, %v576_v33 }
 0x160   :  { %v595_v1 = vadd.f32 %v593_v61, %v591_v54 }
 0x161   :  { %v592_v48 = vadd.f32 %v588_v6, %v586_v59  ;;  %v594_v13 = vadd.f32 %v590_v3, %v584_v47 }
 0x162   :  { %716 = vtanh.f32 %v595_v1 }
 0x163   :  { %v596_v15 = vadd.f32 %v594_v13, %v592_v48 }
 0x165   :  { %718 = vtanh.f32 %v596_v15 }
 0x168   :  { %v717_v21 = vpop.eup %716 }
 0x169   :  { %v616_v14 = vmul.f32 %v717_v21, %v609_v7 }
 0x16b   :  { %v719_v16 = vpop.eup %718 }
 0x16c   :  { %600 = vst [vmem:[#allocation2 + $0x8] sm:$0x3] %v719_v16  ;;  %v617_v29 = vmul.f32 %v719_v16, %v614_v20 }
 0x16e   :  { %v619_v17 = vsel %vm618_vm0, %v617_v29, 0.0 }
 0x16f   :  { %v620_v51 = vadd.f32 %v619_v17, %v616_v14 }
 0x171   :  { %v621_v30 = vrot.slane %v620_v51, 4 }
 0x173   :  { %v622_v23 = vadd.f32 %v621_v30, %v620_v51 }
 0x175   :  { %v623_v50 = vrot.slane %v622_v23, 2 }
 0x177   :  { %v624_v43 = vadd.f32 %v623_v50, %v622_v23 }
 0x179   :  { %v625_v19 = vrot.slane %v624_v43, 1 }
 0x17b   :  { %v626_v31 = vadd.f32 %v625_v19, %v624_v43 }
 0x17d   :  { %v634_v36 = vadd.f32 %v633_v0, %v626_v31 }
 0x17f   :  { %635 = vst [vmem:[#allocation4] sm:$0x1] %v634_v36 }
 0x180   :  { %646 = dma.vmem_to_hbm [thread:$0]  %s642_s12, 16, %s644_s15, [#allocation5]  }
 0x181   :  { %744 = dma.done.wait [#allocation5], 16  }
 0x182   :  { %745 = vsyncadd [#allocation5], 4294967280 }
 0x183   :  { %651 = vsyncpa [#allocation5], 1 }

</bundles_post_ra>
